<compile_context>
chip_gen: v7x
topology: tpu7x:2x2x1
jax: 0.10.0
libtpu: 0.0.40
codegen_flags: <defaults>
</compile_context>

<pallas_src>
import functools

import jax
import jax.numpy as jnp
from jax.experimental import pallas as pl
from jax.experimental.pallas import tpu as pltpu

EPS = 1e-5        # nn.BatchNorm1d default eps
NORM_EPS = 1e-12  # guards rsqrt against all-zero rows (e.g. comp after ReLU)

# contract last dim of both operands: a [M,K] . b [N,K] -> [M,N]
# (native transposed-RHS MXU form; no in-kernel transpose)
_DN_NT = (((1,), (1,)), ((), ()))


def _round_up(x, m):
    return ((x + m - 1) // m) * m


def _fold_bn(w, b, gamma, beta, mean, var):
    """Fold eval-mode BatchNorm1d into the preceding Linear."""
    s = gamma * jax.lax.rsqrt(var + EPS)          # [1, out]
    return w * s, (b - mean) * s + beta


# ---------------------------------------------------------------------------
# Fused head kernel, gridded over pair-text tiles.
# ---------------------------------------------------------------------------
def _cia_head_kernel(img_ref, tp_ref, ta_ref, to_ref,
                     wd_ref, bd_ref, w1_ref, b1_ref, w2_ref, b2_ref,
                     pair_ref, attr_ref, obj_ref, comp_ref,
                     xn_scr, cps_scr, *, d, scale, compute_dtype):
    cd = compute_dtype

    def mm(a, b):      # [M,K] @ [K,N], f32 accumulation on the MXU
        return jnp.dot(a, b, preferred_element_type=jnp.float32)

    def mm_nt(a, b):   # [M,K] . [N,K] -> [M,N], f32 accumulation on the MXU
        return jax.lax.dot_general(a, b, dimension_numbers=_DN_NT,
                                   preferred_element_type=jnp.float32)

    # ---- image-side features: computed once, cached in VMEM scratch ----
    @pl.when(pl.program_id(0) == 0)
    def _():
        x = img_ref[...]                                           # [B, D] f32

        # pair-head query: logit_scale.exp() folded into the row scale
        inv_x = jax.lax.rsqrt(jnp.sum(x * x, axis=-1, keepdims=True) + NORM_EPS)
        xn_scr[...] = (x * (inv_x * scale)).astype(cd)

        # fused disentanglers (BN eval + logit_scale folded into wd/bd):
        #   comp = s * [relu(att_branch) | relu(obj_branch)]
        # TODO(synk): Dropout / F.dropout are eval-mode identities (no RNG mask).
        comp = jnp.maximum(mm(x.astype(cd), wd_ref[...]) + bd_ref[...], 0.0)

        # attr / obj logit heads (their text matrices stay fully resident)
        attr_ref[...] = mm_nt(comp[:, :d].astype(cd), ta_ref[...])  # [B, Na]
        obj_ref[...] = mm_nt(comp[:, d:].astype(cd), to_ref[...])   # [B, No]

        # composer on the L2-normalized comp features (positive scale cancels)
        cn = comp * jax.lax.rsqrt(
            jnp.sum(comp * comp, axis=-1, keepdims=True) + NORM_EPS)
        h = jnp.maximum(mm(cn.astype(cd), w1_ref[...]) + b1_ref[...], 0.0)
        composed = mm(h.astype(cd), w2_ref[...]) + b2_ref[...]
        inv_c = jax.lax.rsqrt(
            jnp.sum(composed * composed, axis=-1, keepdims=True) + NORM_EPS)
        cps_scr[...] = (composed * (inv_c * scale)).astype(cd)

    # ---- per-tile work: one double-buffered pair-text tile vs cached feats ----
    tpt = tp_ref[...]                                              # [tn, D]
    pair_ref[...] = mm_nt(xn_scr[...], tpt)                        # [B, tn]
    comp_ref[...] = mm_nt(cps_scr[...], tpt)                       # [B, tn]


# ---------------------------------------------------------------------------
# One-time parameter / text preparation (hoisted out of the per-call path).
# ---------------------------------------------------------------------------
def prepare_cia_head(params, text_pair, text_attr, text_obj, *,
                     compute_dtype=jnp.float32, tile_n=256):
    d = text_pair.shape[1]
    s = float(params["logit_scale_exp"][0])   # frozen CLIP logit_scale.exp()

    # BN-fold + fuse the two disentanglers into one (D, 2D) linear, and fold
    # the positive logit scale in (columns [0:D] -> attr, [D:2D] -> obj,
    # matching torch.cat((attr, obj), dim=-1)).
    wa, ba = _fold_bn(params["att_dis"]["w"], params["att_dis"]["b"],
                      params["att_dis"]["gamma"], params["att_dis"]["beta"],
                      params["att_dis"]["mean"], params["att_dis"]["var"])
    wo, bo = _fold_bn(params["obj_dis"]["w"], params["obj_dis"]["b"],
                      params["obj_dis"]["gamma"], params["obj_dis"]["beta"],
                      params["obj_dis"]["mean"], params["obj_dis"]["var"])
    wd = jnp.concatenate([wa, wo], axis=1) * s        # [D, 2D]
    bd = jnp.concatenate([ba, bo], axis=1) * s        # [1, 2D]

    cp = params["composer"]
    w1, b1 = _fold_bn(cp["w1"], cp["b1"], cp["gamma"], cp["beta"],
                      cp["mean"], cp["var"])

    # Pair-text tiling: single tile if small, else tile_n-wide tiles (zero-pad
    # the class axis once so the grid divides evenly; padded logits are sliced).
    n_pair = text_pair.shape[0]
    tn = n_pair if n_pair <= tile_n else tile_n
    np_pad = _round_up(n_pair, tn)
    tp = text_pair.astype(compute_dtype)
    if np_pad != n_pair:
        tp = jnp.concatenate(
            [tp, jnp.zeros((np_pad - n_pair, d), compute_dtype)], axis=0)

    arrays = dict(
        tp=tp,
        ta=text_attr.astype(compute_dtype),
        to=text_obj.astype(compute_dtype),
        wd=wd.astype(compute_dtype), bd=bd.astype(jnp.float32),
        w1=w1.astype(compute_dtype), b1=b1.astype(jnp.float32),
        w2=cp["w2"].astype(compute_dtype), b2=cp["b2"].astype(jnp.float32),
    )
    meta = dict(n_pair=n_pair, tn=tn, scale=s)
    return arrays, meta


# ---------------------------------------------------------------------------
# CIA.forward head (post-encoder). Returns [pair, attr, obj, comp] logits.
# ---------------------------------------------------------------------------
@functools.partial(jax.jit, static_argnames=("n_pair", "tn", "scale"))
def cia_forward(batch_img, arrays, *, n_pair, tn, scale):
    B, D = batch_img.shape
    np_pad = arrays["tp"].shape[0]
    n_attr = arrays["ta"].shape[0]
    n_obj = arrays["to"].shape[0]
    compute_dtype = arrays["wd"].dtype
    csize = jnp.dtype(compute_dtype).itemsize
    grid = (np_pad // tn,)

    kernel = functools.partial(_cia_head_kernel, d=D, scale=scale,
                               compute_dtype=compute_dtype)

    in_specs = [
        pl.BlockSpec((B, D), lambda j: (0, 0)),            # batch_img (resident)
        pl.BlockSpec((tn, D), lambda j: (j, 0)),           # pair-text tile (pipelined)
        pl.BlockSpec((n_attr, D), lambda j: (0, 0)),       # attr text (resident)
        pl.BlockSpec((n_obj, D), lambda j: (0, 0)),        # obj text (resident)
        pl.BlockSpec((D, 2 * D), lambda j: (0, 0)),        # fused disentangler W
        pl.BlockSpec((1, 2 * D), lambda j: (0, 0)),        # fused disentangler b
        pl.BlockSpec((2 * D, 4 * D), lambda j: (0, 0)),    # composer W1
        pl.BlockSpec((1, 4 * D), lambda j: (0, 0)),        # composer b1
        pl.BlockSpec((4 * D, D), lambda j: (0, 0)),        # composer W2
        pl.BlockSpec((1, D), lambda j: (0, 0)),            # composer b2
    ]
    out_shape = (
        jax.ShapeDtypeStruct((B, np_pad), jnp.float32),    # pair logits
        jax.ShapeDtypeStruct((B, n_attr), jnp.float32),    # attr logits
        jax.ShapeDtypeStruct((B, n_obj), jnp.float32),     # obj logits
        jax.ShapeDtypeStruct((B, np_pad), jnp.float32),    # comp logits
    )
    out_specs = (
        pl.BlockSpec((B, tn), lambda j: (0, j)),
        pl.BlockSpec((B, n_attr), lambda j: (0, 0)),
        pl.BlockSpec((B, n_obj), lambda j: (0, 0)),
        pl.BlockSpec((B, tn), lambda j: (0, j)),
    )
    scratch_shapes = [pltpu.VMEM((B, D), compute_dtype),   # s * x / ||x||
                      pltpu.VMEM((B, D), compute_dtype)]   # s * composed / ||.||

    # VMEM budget (weights + resident text + double-buffered tiles + scratch)
    resident = (
        B * D * 4
        + (D * 2 * D + 2 * D * 4 * D + 4 * D * D) * csize
        + (2 * D + 4 * D + D) * 4
        + (n_attr + n_obj) * D * csize
        + 2 * tn * D * csize
        + 2 * 2 * B * tn * 4 + B * (n_attr + n_obj) * 4
        + 2 * B * D * csize
    )
    vmem_limit = int(min(max(2 * resident, 32 * 1024 * 1024), 56 * 1024 * 1024))

    flops = 2 * B * (D * 2 * D + 2 * D * 4 * D + 4 * D * D
                     + D * (n_attr + n_obj) + 2 * D * np_pad)
    bytes_accessed = (
        B * D * 4
        + (D * 2 * D + 2 * D * 4 * D + 4 * D * D) * csize
        + (2 * D + 4 * D + D) * 4
        + (np_pad + n_attr + n_obj) * D * csize
        + B * (2 * np_pad + n_attr + n_obj) * 4
    )

    pair_p, attr_l, obj_l, comp_p = pl.pallas_call(
        kernel,
        out_shape=out_shape,
        grid=grid,
        in_specs=in_specs,
        out_specs=out_specs,
        scratch_shapes=scratch_shapes,
        compiler_params=pltpu.CompilerParams(
            dimension_semantics=("arbitrary",),
            vmem_limit_bytes=vmem_limit),
        cost_estimate=pl.CostEstimate(flops=int(flops), transcendentals=0,
                                      bytes_accessed=int(bytes_accessed)),
    )(batch_img, arrays["tp"], arrays["ta"], arrays["to"],
      arrays["wd"], arrays["bd"], arrays["w1"], arrays["b1"],
      arrays["w2"], arrays["b2"])

    pair_logits = pair_p[:, :n_pair]
    comp_logits = comp_p[:, :n_pair]
    return [pair_logits, attr_l, obj_l, comp_logits]


# ---------------------------------------------------------------------------
# Pure-JAX reference (un-folded params; for correctness check only)
# ---------------------------------------------------------------------------
def _ref_forward(batch_img, text_pair, text_attr, text_obj, params):
    s = params["logit_scale_exp"][0]

    def l2n(v):
        return v / jnp.linalg.norm(v, axis=-1, keepdims=True)

    def dis(x, p):
        z = x @ p["w"] + p["b"]
        z = (z - p["mean"]) / jnp.sqrt(p["var"] + EPS) * p["gamma"] + p["beta"]
        return jnp.maximum(z, 0.0)

    def comp_fn(c, p):
        c = l2n(c)
        h = c @ p["w1"] + p["b1"]
        h = (h - p["mean"]) / jnp.sqrt(p["var"] + EPS) * p["gamma"] + p["beta"]
        h = jnp.maximum(h, 0.0)
        return h @ p["w2"] + p["b2"]

    pair = s * l2n(batch_img) @ text_pair.T
    obj_f = dis(batch_img, params["obj_dis"])
    att_f = dis(batch_img, params["att_dis"])
    attr = s * att_f @ text_attr.T
    obj = s * obj_f @ text_obj.T
    composed = l2n(comp_fn(jnp.concatenate([att_f, obj_f], -1), params["composer"]))
    comp = s * composed @ text_pair.T
    return [pair, attr, obj, comp]


# ---------------------------------------------------------------------------
# Deterministic parameter / input construction
# ---------------------------------------------------------------------------
def _make_params(key, D):
    ks = jax.random.split(key, 16)

    def dis_params(k):
        k = jax.random.split(k, 6)
        return {
            "w": jax.random.normal(k[0], (D, D), jnp.float32) * 0.05,
            "b": jax.random.normal(k[1], (1, D), jnp.float32) * 0.01,
            "gamma": 1.0 + 0.1 * jax.random.normal(k[2], (1, D), jnp.float32),
            "beta": 0.1 * jax.random.normal(k[3], (1, D), jnp.float32),
            "mean": 0.1 * jax.random.normal(k[4], (1, D), jnp.float32),
            "var": 1.0 + 0.1 * jax.nn.softplus(jax.random.normal(k[5], (1, D), jnp.float32)),
        }

    kc = jax.random.split(ks[2], 9)
    composer_p = {
        "w1": jax.random.normal(kc[0], (2 * D, 4 * D), jnp.float32) * 0.05,
        "b1": jax.random.normal(kc[1], (1, 4 * D), jnp.float32) * 0.01,
        "gamma": 1.0 + 0.1 * jax.random.normal(kc[2], (1, 4 * D), jnp.float32),
        "beta": 0.1 * jax.random.normal(kc[3], (1, 4 * D), jnp.float32),
        "mean": 0.1 * jax.random.normal(kc[4], (1, 4 * D), jnp.float32),
        "var": 1.0 + 0.1 * jax.nn.softplus(jax.random.normal(kc[5], (1, 4 * D), jnp.float32)),
        "w2": jax.random.normal(kc[6], (4 * D, D), jnp.float32) * 0.05,
        "b2": jax.random.normal(kc[7], (1, D), jnp.float32) * 0.01,
    }

    return {
        "obj_dis": dis_params(ks[0]),
        "att_dis": dis_params(ks[1]),
        "composer": composer_p,
        # CLIP logit_scale init: ln(1/0.07); store exp(logit_scale) as a scalar
        "logit_scale_exp": jnp.array([1.0 / 0.07], dtype=jnp.float32),
    }


if __name__ == "__main__":
    B, D = 8, 128          # batch, CLIP visual output_dim
    N_PAIR, N_ATTR, N_OBJ = 16, 16, 16

    key = jax.random.PRNGKey(0)
    k_img, k_tp, k_ta, k_to, k_par = jax.random.split(key, 5)

    # Stand-ins for the (untranslatable) CLIP encoders' outputs.
    batch_img = jax.random.normal(k_img, (B, D), jnp.float32)

    def l2n(v):
        return v / jnp.linalg.norm(v, axis=-1, keepdims=True)

    text_pair = l2n(jax.random.normal(k_tp, (N_PAIR, D), jnp.float32))
    text_attr = l2n(jax.random.normal(k_ta, (N_ATTR, D), jnp.float32))
    text_obj = l2n(jax.random.normal(k_to, (N_OBJ, D), jnp.float32))

    params = _make_params(k_par, D)
    refs = _ref_forward(batch_img, text_pair, text_attr, text_obj, params)

    # ---- f32 matmul path: tight tolerance against the un-folded reference ----
    arrays32, meta32 = prepare_cia_head(params, text_pair, text_attr, text_obj,
                                        compute_dtype=jnp.float32, tile_n=256)
    outs = cia_forward(batch_img, arrays32, **meta32)
    outs = [jax.block_until_ready(o) for o in outs]
    for o, r in zip(outs, refs):
        assert o.shape == r.shape, (o.shape, r.shape)
        err = float(jnp.max(jnp.abs(o - r)))
        tol = 1e-3 * (1.0 + float(jnp.max(jnp.abs(r))))
        assert err < tol, (err, tol)

    # ---- bf16 operands / f32 accumulation (MXU-native): loose tolerance ----
    arrays16, meta16 = prepare_cia_head(params, text_pair, text_attr, text_obj,
                                        compute_dtype=jnp.bfloat16, tile_n=256)
    outs16 = cia_forward(batch_img, arrays16, **meta16)
    outs16 = [jax.block_until_ready(o) for o in outs16]
    for o, r in zip(outs16, refs):
        assert o.shape == r.shape, (o.shape, r.shape)
        err = float(jnp.max(jnp.abs(o - r)))
        tol = 5e-2 * (1.0 + float(jnp.max(jnp.abs(r))))
        assert err < tol, (err, tol)

    print("KERNEL_OK")
</pallas_src>

<mosaic_0001>
module attributes {stable_mosaic.version = 11 : i64} {
  func.func @_cia_head_kernel(%arg0: i32, %arg1: memref<8x128xf32, #tpu.memory_space<vmem>>, %arg2: memref<16x128xf32, #tpu.memory_space<vmem>>, %arg3: memref<16x128xf32, #tpu.memory_space<vmem>>, %arg4: memref<16x128xf32, #tpu.memory_space<vmem>>, %arg5: memref<128x256xf32, #tpu.memory_space<vmem>>, %arg6: memref<1x256xf32, #tpu.memory_space<vmem>>, %arg7: memref<256x512xf32, #tpu.memory_space<vmem>>, %arg8: memref<1x512xf32, #tpu.memory_space<vmem>>, %arg9: memref<512x128xf32, #tpu.memory_space<vmem>>, %arg10: memref<1x128xf32, #tpu.memory_space<vmem>>, %arg11: memref<8x16xf32, #tpu.memory_space<vmem>>, %arg12: memref<8x16xf32, #tpu.memory_space<vmem>>, %arg13: memref<8x16xf32, #tpu.memory_space<vmem>>, %arg14: memref<8x16xf32, #tpu.memory_space<vmem>>, %arg15: memref<8x128xf32, #tpu.memory_space<vmem>>, %arg16: memref<8x128xf32, #tpu.memory_space<vmem>>) attributes {dimension_semantics = [#tpu.dimension_semantics<arbitrary>], iteration_bounds = array<i64: 1>, scalar_prefetch = 0 : i64, scratch_operands = 2 : i64, tpu.core_type = #tpu.core_type<tc>, window_params = [{pipeline_mode = #tpu.pipeline_mode<synchronous>, transform_indices = @transform_0, window_bounds = array<i64: 8, 128>}, {transform_indices = @transform_1, window_bounds = array<i64: 16, 128>}, {pipeline_mode = #tpu.pipeline_mode<synchronous>, transform_indices = @transform_2, window_bounds = array<i64: 16, 128>}, {pipeline_mode = #tpu.pipeline_mode<synchronous>, transform_indices = @transform_3, window_bounds = array<i64: 16, 128>}, {pipeline_mode = #tpu.pipeline_mode<synchronous>, transform_indices = @transform_4, window_bounds = array<i64: 128, 256>}, {pipeline_mode = #tpu.pipeline_mode<synchronous>, transform_indices = @transform_5, window_bounds = array<i64: 1, 256>}, {pipeline_mode = #tpu.pipeline_mode<synchronous>, transform_indices = @transform_6, window_bounds = array<i64: 256, 512>}, {pipeline_mode = #tpu.pipeline_mode<synchronous>, transform_indices = @transform_7, window_bounds = array<i64: 1, 512>}, {pipeline_mode = #tpu.pipeline_mode<synchronous>, transform_indices = @transform_8, window_bounds = array<i64: 512, 128>}, {pipeline_mode = #tpu.pipeline_mode<synchronous>, transform_indices = @transform_9, window_bounds = array<i64: 1, 128>}, {transform_indices = @transform_10, window_bounds = array<i64: 8, 16>}, {pipeline_mode = #tpu.pipeline_mode<synchronous>, transform_indices = @transform_11, window_bounds = array<i64: 8, 16>}, {pipeline_mode = #tpu.pipeline_mode<synchronous>, transform_indices = @transform_12, window_bounds = array<i64: 8, 16>}, {transform_indices = @transform_13, window_bounds = array<i64: 8, 16>}]} {
    %c0_i32 = arith.constant 0 : i32
    %0 = arith.cmpi eq, %arg0, %c0_i32 : i32
    %1 = arith.extui %0 : i1 to i32
    %c0_i32_0 = arith.constant 0 : i32
    %2 = arith.cmpi ne, %1, %c0_i32_0 : i32
    scf.if %2 {
      %c0_11 = arith.constant 0 : index
      %c0_12 = arith.constant 0 : index
      %10 = vector.load %arg1[%c0_11, %c0_12] : memref<8x128xf32, #tpu.memory_space<vmem>>, vector<8x128xf32>
      %11 = arith.mulf %10, %10 : vector<8x128xf32>
      %cst_13 = arith.constant dense<0.000000e+00> : vector<8xf32>
      %12 = vector.multi_reduction <add>, %11, %cst_13 [1] : vector<8x128xf32> to vector<8xf32>
      %13 = vector.shape_cast %12 : vector<8xf32> to vector<8x1xf32>
      %cst_14 = arith.constant 9.99999996E-13 : f32
      %14 = vector.broadcast %cst_14 : f32 to vector<8x1xf32>
      %15 = arith.addf %13, %14 : vector<8x1xf32>
      %16 = math.rsqrt %15 : vector<8x1xf32>
      %cst_15 = arith.constant 14.2857141 : f32
      %17 = vector.broadcast %cst_15 : f32 to vector<8x1xf32>
      %18 = arith.mulf %16, %17 : vector<8x1xf32>
      %19 = vector.broadcast %18 : vector<8x1xf32> to vector<8x128xf32>
      %20 = arith.mulf %10, %19 : vector<8x128xf32>
      %c0_16 = arith.constant 0 : index
      %c0_17 = arith.constant 0 : index
      %21 = vector.load %arg15[%c0_16, %c0_17] : memref<8x128xf32, #tpu.memory_space<vmem>>, vector<8x128xf32>
      tpu.vector_store %arg15[%c0_16, %c0_17], %20 {strides = array<i32>} : memref<8x128xf32, #tpu.memory_space<vmem>>, vector<8x128xf32>,
      %c0_18 = arith.constant 0 : index
      %c0_19 = arith.constant 0 : index
      %22 = vector.load %arg5[%c0_18, %c0_19] : memref<128x256xf32, #tpu.memory_space<vmem>>, vector<128x256xf32>
      %cst_20 = arith.constant dense<0.000000e+00> : vector<8x256xf32>
      %23 = tpu.matmul %10, %22, %cst_20 {dimension_numbers = #tpu.dot_dimension_numbers<[1], [0], [0], [1], [0, 0, 1, 1], [], []>} : vector<8x128xf32>, vector<128x256xf32>, vector<8x256xf32> -> vector<8x256xf32>
      %c0_21 = arith.constant 0 : index
      %c0_22 = arith.constant 0 : index
      %24 = vector.load %arg6[%c0_21, %c0_22] : memref<1x256xf32, #tpu.memory_space<vmem>>, vector<1x256xf32>
      %25 = vector.broadcast %24 : vector<1x256xf32> to vector<8x256xf32>
      %26 = arith.addf %23, %25 : vector<8x256xf32>
      %cst_23 = arith.constant 0.000000e+00 : f32
      %27 = vector.broadcast %cst_23 : f32 to vector<8x256xf32>
      %28 = arith.maximumf %26, %27 : vector<8x256xf32>
      %29 = vector.extract_strided_slice %28 {offsets = [0, 0], sizes = [8, 128], strides = [1, 1]} : vector<8x256xf32> to vector<8x128xf32>
      %c0_24 = arith.constant 0 : index
      %c0_25 = arith.constant 0 : index
      %30 = vector.load %arg3[%c0_24, %c0_25] : memref<16x128xf32, #tpu.memory_space<vmem>>, vector<16x128xf32>
      %cst_26 = arith.constant dense<0.000000e+00> : vector<8x16xf32>
      %31 = tpu.matmul %29, %30, %cst_26 {dimension_numbers = #tpu.dot_dimension_numbers<[1], [1], [0], [0], [0, 0, 1, 0], [], []>} : vector<8x128xf32>, vector<16x128xf32>, vector<8x16xf32> -> vector<8x16xf32>
      %c0_27 = arith.constant 0 : index
      %c0_28 = arith.constant 0 : index
      %32 = vector.load %arg12[%c0_27, %c0_28] : memref<8x16xf32, #tpu.memory_space<vmem>>, vector<8x16xf32>
      tpu.vector_store %arg12[%c0_27, %c0_28], %31 {strides = array<i32>} : memref<8x16xf32, #tpu.memory_space<vmem>>, vector<8x16xf32>,
      %33 = vector.extract_strided_slice %28 {offsets = [0, 128], sizes = [8, 128], strides = [1, 1]} : vector<8x256xf32> to vector<8x128xf32>
      %c0_29 = arith.constant 0 : index
      %c0_30 = arith.constant 0 : index
      %34 = vector.load %arg4[%c0_29, %c0_30] : memref<16x128xf32, #tpu.memory_space<vmem>>, vector<16x128xf32>
      %cst_31 = arith.constant dense<0.000000e+00> : vector<8x16xf32>
      %35 = tpu.matmul %33, %34, %cst_31 {dimension_numbers = #tpu.dot_dimension_numbers<[1], [1], [0], [0], [0, 0, 1, 0], [], []>} : vector<8x128xf32>, vector<16x128xf32>, vector<8x16xf32> -> vector<8x16xf32>
      %c0_32 = arith.constant 0 : index
      %c0_33 = arith.constant 0 : index
      %36 = vector.load %arg13[%c0_32, %c0_33] : memref<8x16xf32, #tpu.memory_space<vmem>>, vector<8x16xf32>
      tpu.vector_store %arg13[%c0_32, %c0_33], %35 {strides = array<i32>} : memref<8x16xf32, #tpu.memory_space<vmem>>, vector<8x16xf32>,
      %37 = arith.mulf %28, %28 : vector<8x256xf32>
      %cst_34 = arith.constant dense<0.000000e+00> : vector<8xf32>
      %38 = vector.multi_reduction <add>, %37, %cst_34 [1] : vector<8x256xf32> to vector<8xf32>
      %39 = vector.shape_cast %38 : vector<8xf32> to vector<8x1xf32>
      %cst_35 = arith.constant 9.99999996E-13 : f32
      %40 = vector.broadcast %cst_35 : f32 to vector<8x1xf32>
      %41 = arith.addf %39, %40 : vector<8x1xf32>
      %42 = math.rsqrt %41 : vector<8x1xf32>
      %43 = vector.broadcast %42 : vector<8x1xf32> to vector<8x256xf32>
      %44 = arith.mulf %28, %43 : vector<8x256xf32>
      %c0_36 = arith.constant 0 : index
      %c0_37 = arith.constant 0 : index
      %45 = vector.load %arg7[%c0_36, %c0_37] : memref<256x512xf32, #tpu.memory_space<vmem>>, vector<256x512xf32>
      %cst_38 = arith.constant dense<0.000000e+00> : vector<8x512xf32>
      %46 = tpu.matmul %44, %45, %cst_38 {dimension_numbers = #tpu.dot_dimension_numbers<[1], [0], [0], [1], [0, 0, 1, 1], [], []>} : vector<8x256xf32>, vector<256x512xf32>, vector<8x512xf32> -> vector<8x512xf32>
      %c0_39 = arith.constant 0 : index
      %c0_40 = arith.constant 0 : index
      %47 = vector.load %arg8[%c0_39, %c0_40] : memref<1x512xf32, #tpu.memory_space<vmem>>, vector<1x512xf32>
      %48 = vector.broadcast %47 : vector<1x512xf32> to vector<8x512xf32>
      %49 = arith.addf %46, %48 : vector<8x512xf32>
      %cst_41 = arith.constant 0.000000e+00 : f32
      %50 = vector.broadcast %cst_41 : f32 to vector<8x512xf32>
      %51 = arith.maximumf %49, %50 : vector<8x512xf32>
      %c0_42 = arith.constant 0 : index
      %c0_43 = arith.constant 0 : index
      %52 = vector.load %arg9[%c0_42, %c0_43] : memref<512x128xf32, #tpu.memory_space<vmem>>, vector<512x128xf32>
      %cst_44 = arith.constant dense<0.000000e+00> : vector<8x128xf32>
      %53 = tpu.matmul %51, %52, %cst_44 {dimension_numbers = #tpu.dot_dimension_numbers<[1], [0], [0], [1], [0, 0, 1, 1], [], []>} : vector<8x512xf32>, vector<512x128xf32>, vector<8x128xf32> -> vector<8x128xf32>
      %c0_45 = arith.constant 0 : index
      %c0_46 = arith.constant 0 : index
      %54 = vector.load %arg10[%c0_45, %c0_46] : memref<1x128xf32, #tpu.memory_space<vmem>>, vector<1x128xf32>
      %55 = vector.broadcast %54 : vector<1x128xf32> to vector<8x128xf32>
      %56 = arith.addf %53, %55 : vector<8x128xf32>
      %57 = arith.mulf %56, %56 : vector<8x128xf32>
      %cst_47 = arith.constant dense<0.000000e+00> : vector<8xf32>
      %58 = vector.multi_reduction <add>, %57, %cst_47 [1] : vector<8x128xf32> to vector<8xf32>
      %59 = vector.shape_cast %58 : vector<8xf32> to vector<8x1xf32>
      %cst_48 = arith.constant 9.99999996E-13 : f32
      %60 = vector.broadcast %cst_48 : f32 to vector<8x1xf32>
      %61 = arith.addf %59, %60 : vector<8x1xf32>
      %62 = math.rsqrt %61 : vector<8x1xf32>
      %cst_49 = arith.constant 14.2857141 : f32
      %63 = vector.broadcast %cst_49 : f32 to vector<8x1xf32>
      %64 = arith.mulf %62, %63 : vector<8x1xf32>
      %65 = vector.broadcast %64 : vector<8x1xf32> to vector<8x128xf32>
      %66 = arith.mulf %56, %65 : vector<8x128xf32>
      %c0_50 = arith.constant 0 : index
      %c0_51 = arith.constant 0 : index
      %67 = vector.load %arg16[%c0_50, %c0_51] : memref<8x128xf32, #tpu.memory_space<vmem>>, vector<8x128xf32>
      tpu.vector_store %arg16[%c0_50, %c0_51], %66 {strides = array<i32>} : memref<8x128xf32, #tpu.memory_space<vmem>>, vector<8x128xf32>,
    } else {
    }
    %c0 = arith.constant 0 : index
    %c0_1 = arith.constant 0 : index
    %3 = vector.load %arg2[%c0, %c0_1] : memref<16x128xf32, #tpu.memory_space<vmem>>, vector<16x128xf32>
    %c0_2 = arith.constant 0 : index
    %c0_3 = arith.constant 0 : index
    %4 = vector.load %arg15[%c0_2, %c0_3] : memref<8x128xf32, #tpu.memory_space<vmem>>, vector<8x128xf32>
    %cst = arith.constant dense<0.000000e+00> : vector<8x16xf32>
    %5 = tpu.matmul %4, %3, %cst {dimension_numbers = #tpu.dot_dimension_numbers<[1], [1], [0], [0], [0, 0, 1, 0], [], []>} : vector<8x128xf32>, vector<16x128xf32>, vector<8x16xf32> -> vector<8x16xf32>
    %c0_4 = arith.constant 0 : index
    %c0_5 = arith.constant 0 : index
    %6 = vector.load %arg11[%c0_4, %c0_5] : memref<8x16xf32, #tpu.memory_space<vmem>>, vector<8x16xf32>
    tpu.vector_store %arg11[%c0_4, %c0_5], %5 {strides = array<i32>} : memref<8x16xf32, #tpu.memory_space<vmem>>, vector<8x16xf32>,
    %c0_6 = arith.constant 0 : index
    %c0_7 = arith.constant 0 : index
    %7 = vector.load %arg16[%c0_6, %c0_7] : memref<8x128xf32, #tpu.memory_space<vmem>>, vector<8x128xf32>
    %cst_8 = arith.constant dense<0.000000e+00> : vector<8x16xf32>
    %8 = tpu.matmul %7, %3, %cst_8 {dimension_numbers = #tpu.dot_dimension_numbers<[1], [1], [0], [0], [0, 0, 1, 0], [], []>} : vector<8x128xf32>, vector<16x128xf32>, vector<8x16xf32> -> vector<8x16xf32>
    %c0_9 = arith.constant 0 : index
    %c0_10 = arith.constant 0 : index
    %9 = vector.load %arg14[%c0_9, %c0_10] : memref<8x16xf32, #tpu.memory_space<vmem>>, vector<8x16xf32>
    tpu.vector_store %arg14[%c0_9, %c0_10], %8 {strides = array<i32>} : memref<8x16xf32, #tpu.memory_space<vmem>>, vector<8x16xf32>,
    return
  }
  func.func @transform_0(%arg0: i32) -> (i32, i32) {
    %c0_i32 = arith.constant 0 : i32
    %c0_i32_0 = arith.constant 0 : i32
    %c0_i32_1 = arith.constant 0 : i32
    return %c0_i32, %c0_i32_0 : i32, i32
  }
  func.func @transform_1(%arg0: i32) -> (i32, i32) {
    %c0_i32 = arith.constant 0 : i32
    %c0_i32_0 = arith.constant 0 : i32
    return %arg0, %c0_i32 : i32, i32
  }
  func.func @transform_2(%arg0: i32) -> (i32, i32) {
    %c0_i32 = arith.constant 0 : i32
    %c0_i32_0 = arith.constant 0 : i32
    %c0_i32_1 = arith.constant 0 : i32
    return %c0_i32, %c0_i32_0 : i32, i32
  }
  func.func @transform_3(%arg0: i32) -> (i32, i32) {
    %c0_i32 = arith.constant 0 : i32
    %c0_i32_0 = arith.constant 0 : i32
    %c0_i32_1 = arith.constant 0 : i32
    return %c0_i32, %c0_i32_0 : i32, i32
  }
  func.func @transform_4(%arg0: i32) -> (i32, i32) {
    %c0_i32 = arith.constant 0 : i32
    %c0_i32_0 = arith.constant 0 : i32
    %c0_i32_1 = arith.constant 0 : i32
    return %c0_i32, %c0_i32_0 : i32, i32
  }
  func.func @transform_5(%arg0: i32) -> (i32, i32) {
    %c0_i32 = arith.constant 0 : i32
    %c0_i32_0 = arith.constant 0 : i32
    %c0_i32_1 = arith.constant 0 : i32
    return %c0_i32, %c0_i32_0 : i32, i32
  }
  func.func @transform_6(%arg0: i32) -> (i32, i32) {
    %c0_i32 = arith.constant 0 : i32
    %c0_i32_0 = arith.constant 0 : i32
    %c0_i32_1 = arith.constant 0 : i32
    return %c0_i32, %c0_i32_0 : i32, i32
  }
  func.func @transform_7(%arg0: i32) -> (i32, i32) {
    %c0_i32 = arith.constant 0 : i32
    %c0_i32_0 = arith.constant 0 : i32
    %c0_i32_1 = arith.constant 0 : i32
    return %c0_i32, %c0_i32_0 : i32, i32
  }
  func.func @transform_8(%arg0: i32) -> (i32, i32) {
    %c0_i32 = arith.constant 0 : i32
    %c0_i32_0 = arith.constant 0 : i32
    %c0_i32_1 = arith.constant 0 : i32
    return %c0_i32, %c0_i32_0 : i32, i32
  }
  func.func @transform_9(%arg0: i32) -> (i32, i32) {
    %c0_i32 = arith.constant 0 : i32
    %c0_i32_0 = arith.constant 0 : i32
    %c0_i32_1 = arith.constant 0 : i32
    return %c0_i32, %c0_i32_0 : i32, i32
  }
  func.func @transform_10(%arg0: i32) -> (i32, i32) {
    %c0_i32 = arith.constant 0 : i32
    %c0_i32_0 = arith.constant 0 : i32
    return %c0_i32, %arg0 : i32, i32
  }
  func.func @transform_11(%arg0: i32) -> (i32, i32) {
    %c0_i32 = arith.constant 0 : i32
    %c0_i32_0 = arith.constant 0 : i32
    %c0_i32_1 = arith.constant 0 : i32
    return %c0_i32, %c0_i32_0 : i32, i32
  }
  func.func @transform_12(%arg0: i32) -> (i32, i32) {
    %c0_i32 = arith.constant 0 : i32
    %c0_i32_0 = arith.constant 0 : i32
    %c0_i32_1 = arith.constant 0 : i32
    return %c0_i32, %c0_i32_0 : i32, i32
  }
  func.func @transform_13(%arg0: i32) -> (i32, i32) {
    %c0_i32 = arith.constant 0 : i32
    %c0_i32_0 = arith.constant 0 : i32
    return %c0_i32, %arg0 : i32, i32
  }
}

</mosaic_0001>

<bundles_post_ra>
// kernel: cia_forward.1
= control target key start
LH: loop header
LB: loop body
LE: loop exit
PB: predicated region body
PF: predicated region fallthrough
CT: control target
= control target key end

     0   :  { %19 = vsyncpa [#allocation5], 0  ;;  %s2068_s0 = inlined_call_operand.hbm [shape: f32[8,128], index: 0, kind: input, shape index: {}]   ;;  %s2069_s1 = inlined_call_operand.vmem [shape: f32[16,128], index: 1, kind: input, shape index: {}]   ;;  %s2070_s2 = inlined_call_operand.hbm [shape: f32[16,128], index: 2, kind: input, shape index: {}]   ;;  %s2071_s3 = inlined_call_operand.hbm [shape: f32[16,128], index: 3, kind: input, shape index: {}]   ;;  %s2072_s4 = inlined_call_operand.hbm [shape: f32[128,256], index: 4, kind: input, shape index: {}]   ;;  %s2073_s5 = inlined_call_operand.vmem [shape: f32[1,256], index: 5, kind: input, shape index: {}]   ;;  %s2074_s6 = inlined_call_operand.hbm [shape: f32[256,512], index: 6, kind: input, shape index: {}]   ;;  %s2075_s7 = inlined_call_operand.hbm [shape: f32[1,512], index: 7, kind: input, shape index: {}]   ;;  %s2076_s8 = inlined_call_operand.hbm [shape: f32[512,128], index: 8, kind: input, shape index: {}]   ;;  %s2077_s9 = inlined_call_operand.vmem [shape: f32[1,128], index: 9, kind: input, shape index: {}]   ;;  %s2078_s10 = inlined_call_operand.hbm [shape: f32[8,16], index: 10, kind: output, shape index: {0}]   ;;  %s2079_s11 = inlined_call_operand.hbm [shape: f32[8,16], index: 11, kind: output, shape index: {1}]   ;;  %s2080_s12 = inlined_call_operand.hbm [shape: f32[8,16], index: 12, kind: output, shape index: {2}]   ;;  %s2081_s13 = inlined_call_operand.hbm [shape: f32[8,16], index: 13, kind: output, shape index: {3}]  }
   0x1   :  { %20 = vsyncpa [#allocation8], 0 }
   0x2   :  { %21 = vsyncpa [#allocation11], 0 }
   0x3   :  { %22 = vsyncpa [#allocation14], 0 }
   0x4   :  { %23 = vsyncpa [#allocation6], 0 }
   0x5   :  { %24 = vsyncpa [#allocation18], 0 }
   0x6   :  { %25 = vsyncpa [#allocation21], 0  ;;  %s1769_s25 = smov [#allocation7]   ;;  %s1513_s29 = scalar_lea.hbm %s2070_s2, 256 }
   0x7   :  { %s43_s26 = sshll.u32 %s1769_s25, 4  ;;  %p1514_p0 = scmp.ne.s32.totalorder %s2070_s2, %s1513_s29  ;;  %s44_s26 = int_to_ptr.vmem [resolvable:$true] %s43_s26 }
   0x8   :  { %p1517_p1 = scmp.lt.u32.totalorder %s1513_s29, %s2070_s2 }
   0xa   :  { %p1519_p2 = pnand %p1517_p1, %p1514_p0 }
   0xc   :  { %1522 = shalt.err (!%p1519_p2)
}
   0xd   :  { %s1523_s17 = scalar_lea.vmem %s44_s26, 256  ;;  %p1528_p4 = scmp.lt.s32.totalorder %s44_s26, %s44_s26 }
   0xe   :  { %p1524_p3 = scmp.ne.s32.totalorder %s44_s26, %s1523_s17  ;;  %p1529_p5 = scmp.lt.s32.totalorder %s1523_s17, %s1523_s17 }
  0x10   :  { %p1530_p6 = por %p1529_p5, %p1528_p4 }
  0x12   :  { %p1531_p7 = pnand %p1530_p6, %p1524_p3 }
  0x14   :  { %1534 = shalt.err (!%p1531_p7)
}
  0x15   :  { %s1770_s18 = smov 128   ;;  %s1771_s19 = smov 8  }
  0x16   :  { %49 = dma.hbm_to_vmem [thread:$0]  %s2070_s2, 256, %s44_s26, [#allocation8], %s1770_s18, %s1770_s18, %s1771_s19  }
  0x17   :  { %s1772_s22 = smov [#allocation10]   ;;  %s1535_s27 = scalar_lea.hbm %s2072_s4, 4096 }
  0x18   :  { %s67_s23 = sshll.u32 %s1772_s22, 4  ;;  %p1536_p8 = scmp.ne.s32.totalorder %s2072_s4, %s1535_s27  ;;  %s68_s23 = int_to_ptr.vmem [resolvable:$true] %s67_s23 }
  0x19   :  { %p1539_p9 = scmp.lt.u32.totalorder %s1535_s27, %s2072_s4 }
  0x1b   :  { %p1541_p10 = pnand %p1539_p9, %p1536_p8 }
  0x1d   :  { %1544 = shalt.err (!%p1541_p10)
}
  0x1e   :  { %s1545_s15 = scalar_lea.vmem %s68_s23, 4096  ;;  %p1550_p12 = scmp.lt.s32.totalorder %s68_s23, %s68_s23 }
  0x1f   :  { %p1546_p11 = scmp.ne.s32.totalorder %s68_s23, %s1545_s15  ;;  %p1551_p13 = scmp.lt.s32.totalorder %s1545_s15, %s1545_s15 }
  0x21   :  { %p1552_p0 = por %p1551_p13, %p1550_p12 }
  0x23   :  { %p1553_p1 = pnand %p1552_p0, %p1546_p11 }
  0x25   :  { %1556 = shalt.err (!%p1553_p1)
}
  0x26   :  { %s1773_s2 = smov 256   ;;  %s1774_s26 = smov 16  }
  0x27   :  { %73 = dma.hbm_to_vmem [thread:$0]  %s2072_s4, 4096, %s68_s23, [#allocation11], %s1773_s2, %s1773_s2, %s1774_s26  }
  0x28   :  { %s1775_s20 = smov [#allocation13]   ;;  %s1776_s22 = smov [#allocation4]  }
  0x29   :  { %s94_s21 = sshll.u32 %s1775_s20, 4  ;;  %s32_s24 = sshll.u32 %s1776_s22, 4  ;;  %s95_s21 = int_to_ptr.vmem [resolvable:$true] %s94_s21  ;;  %s33_s24 = int_to_ptr.vmem [resolvable:$true] %s32_s24 }
  0x2a   :  { %s1557_s28 = scalar_lea.hbm %s2075_s7, 64 }
  0x2b   :  { %p1558_p2 = scmp.ne.s32.totalorder %s2075_s7, %s1557_s28  ;;  %p1561_p3 = scmp.lt.u32.totalorder %s1557_s28, %s2075_s7 }
  0x2d   :  { %p1563_p4 = pnand %p1561_p3, %p1558_p2 }
  0x2f   :  { %1566 = shalt.err (!%p1563_p4)
}
  0x30   :  { %s1567_s4 = scalar_lea.vmem %s95_s21, 64  ;;  %p1572_p6 = scmp.lt.s32.totalorder %s95_s21, %s95_s21 }
  0x31   :  { %p1568_p5 = scmp.ne.s32.totalorder %s95_s21, %s1567_s4  ;;  %p1573_p7 = scmp.lt.s32.totalorder %s1567_s4, %s1567_s4 }
  0x33   :  { %p1574_p8 = por %p1573_p7, %p1572_p6 }
  0x35   :  { %p1575_p9 = pnand %p1574_p8, %p1568_p5 }
  0x37   :  { %1578 = shalt.err (!%p1575_p9)
}
  0x38   :  { %97 = dma.hbm_to_vmem [thread:$0]  %s2075_s7, 64, %s95_s21, [#allocation14]  }
  0x39   :  { %s1579_s17 = scalar_lea.hbm %s2068_s0, 128 }
  0x3a   :  { %p1580_p10 = scmp.ne.s32.totalorder %s2068_s0, %s1579_s17  ;;  %p1583_p11 = scmp.lt.u32.totalorder %s1579_s17, %s2068_s0 }
  0x3c   :  { %p1585_p12 = pnand %p1583_p11, %p1580_p10 }
  0x3e   :  { %1588 = shalt.err (!%p1585_p12)
}
  0x3f   :  { %s1589_s28 = scalar_lea.vmem %s33_s24, 128  ;;  %p1594_p0 = scmp.lt.s32.totalorder %s33_s24, %s33_s24 }
  0x40   :  { %p1590_p13 = scmp.ne.s32.totalorder %s33_s24, %s1589_s28  ;;  %p1595_p1 = scmp.lt.s32.totalorder %s1589_s28, %s1589_s28 }
  0x42   :  { %p1596_p2 = por %p1595_p1, %p1594_p0 }
  0x44   :  { %p1597_p3 = pnand %p1596_p2, %p1590_p13 }
  0x46   :  { %1600 = shalt.err (!%p1597_p3)
}
  0x47   :  { %35 = dma.hbm_to_vmem [thread:$0]  %s2068_s0, 128, %s33_s24, [#allocation5]  }
  0x48   :  { %s1777_s29 = smov [#allocation9]   ;;  %s1778_s14 = smov [#allocation12]  }
  0x49   :  { %s55_s30 = sshll.u32 %s1777_s29, 4  ;;  %s81_s15 = sshll.u32 %s1778_s14, 4  ;;  %s56_s30 = int_to_ptr.vmem [resolvable:$true] %s55_s30  ;;  %s1910_s15 = int_to_ptr.vmem [resolvable:$true] %s81_s15 }
  0x4a   :  { %s1601_s2 = scalar_lea.hbm %s2071_s3, 256 }
  0x4b   :  { %p1602_p4 = scmp.ne.s32.totalorder %s2071_s3, %s1601_s2  ;;  %p1605_p5 = scmp.lt.u32.totalorder %s1601_s2, %s2071_s3 }
  0x4d   :  { %p1607_p6 = pnand %p1605_p5, %p1602_p4 }
  0x4f   :  { %1610 = shalt.err (!%p1607_p6)
}
  0x50   :  { %s1611_s0 = scalar_lea.vmem %s56_s30, 256  ;;  %p1616_p8 = scmp.lt.s32.totalorder %s56_s30, %s56_s30 }
  0x51   :  { %p1612_p7 = scmp.ne.s32.totalorder %s56_s30, %s1611_s0  ;;  %p1617_p9 = scmp.lt.s32.totalorder %s1611_s0, %s1611_s0 }
  0x53   :  { %p1618_p10 = por %p1617_p9, %p1616_p8 }
  0x55   :  { %p1619_p11 = pnand %p1618_p10, %p1612_p7 }
  0x57   :  { %1622 = shalt.err (!%p1619_p11)
}
  0x58   :  { %61 = dma.hbm_to_vmem [thread:$0]  %s2071_s3, 256, %s56_s30, [#allocation8], %s1770_s18, %s1770_s18, %s1771_s19  }
  0x59   :  { %s1623_s28 = scalar_lea.hbm %s2074_s6, 16384 }
  0x5a   :  { %p1624_p12 = scmp.ne.s32.totalorder %s2074_s6, %s1623_s28  ;;  %p1627_p13 = scmp.lt.u32.totalorder %s1623_s28, %s2074_s6 }
  0x5c   :  { %p1629_p0 = pnand %p1627_p13, %p1624_p12 }
  0x5e   :  { %1632 = shalt.err (!%p1629_p0)
}
  0x5f   :  { %s1633_s4 = scalar_lea.vmem %s1910_s15, 16384  ;;  %p1638_p2 = scmp.lt.s32.totalorder %s1910_s15, %s1910_s15 }
  0x60   :  { %p1634_p1 = scmp.ne.s32.totalorder %s1910_s15, %s1633_s4  ;;  %p1639_p3 = scmp.lt.s32.totalorder %s1633_s4, %s1633_s4 }
  0x62   :  { %p1640_p4 = por %p1639_p3, %p1638_p2 }
  0x64   :  { %p1641_p5 = pnand %p1640_p4, %p1634_p1 }
  0x66   :  { %1644 = shalt.err (!%p1641_p5)
}
  0x67   :  { %s1779_s3 = smov 512   ;;  %s1780_s30 = smov 32  }
  0x68   :  { %87 = dma.hbm_to_vmem [thread:$0]  %s2074_s6, 16384, %s1910_s15, [#allocation11], %s1779_s3, %s1779_s3, %s1780_s30  }
  0x69   :  { %s1781_s26 = smov [#allocation15]   ;;  %s1645_s0 = scalar_lea.hbm %s2076_s8, 8192 }
  0x6a   :  { %s103_s16 = sshll.u32 %s1781_s26, 4  ;;  %p1646_p6 = scmp.ne.s32.totalorder %s2076_s8, %s1645_s0  ;;  %s104_s16 = int_to_ptr.vmem [resolvable:$true] %s103_s16 }
  0x6b   :  { %p1649_p7 = scmp.lt.u32.totalorder %s1645_s0, %s2076_s8 }
  0x6d   :  { %p1651_p8 = pnand %p1649_p7, %p1646_p6 }
  0x6f   :  { %1654 = shalt.err (!%p1651_p8)
}
  0x70   :  { %s1655_s28 = scalar_lea.vmem %s104_s16, 8192  ;;  %p1660_p10 = scmp.lt.s32.totalorder %s104_s16, %s104_s16 }
  0x71   :  { %p1656_p9 = scmp.ne.s32.totalorder %s104_s16, %s1655_s28  ;;  %p1661_p11 = scmp.lt.s32.totalorder %s1655_s28, %s1655_s28 }
  0x73   :  { %p1662_p12 = por %p1661_p11, %p1660_p10 }
  0x75   :  { %p1663_p13 = pnand %p1662_p12, %p1656_p9 }
  0x77   :  { %1666 = shalt.err (!%p1663_p13)
}
  0x78   :  { %109 = dma.hbm_to_vmem [thread:$0]  %s2076_s8, 8192, %s104_s16, [#allocation14], %s1770_s18, %s1770_s18, %s1771_s19  }
  0x79   :  { %1755 = dma.done.wait [#allocation5], 128  }
  0x7a   :  { %1756 = vsyncadd [#allocation5], 4294967168 }
  0x7b   :  { %1757 = dma.done.wait [#allocation8], 512  }
  0x7c   :  { %1758 = vsyncadd [#allocation8], 4294966784 }
  0x7d   :  { %1759 = dma.done.wait [#allocation11], 20480  }
  0x7e   :  { %1760 = vsyncadd [#allocation11], 4294946816 }
  0x7f   :  { %1761 = dma.done.wait [#allocation14], 8256  }
  0x80   :  { %1762 = vsyncadd [#allocation14], 4294959040  ;;  %v1782_v0 = vmov 0.0   ;;  %v1783_v1 = vmov 0.0|0.0   ;;  %v147_v2 = vld [vmem:[#allocation10 + $0x8] sm:$0xff]  ;;  %v149_v3 = vld [vmem:[#allocation10 + $0x18] sm:$0xff] }
  0x81   :  { %254 = vmatprep.mubr.f32.mxu0 %v1782_v0  ;;  %1283 = vmatprep.subr.bf16.mxu1 %v1783_v1  ;;  %v146_v4 = vld [vmem:[#allocation10] sm:$0xff]  ;;  %v1251_v5 = vpack.c.bf16 %v149_v3, %v147_v2  ;;  %v148_v6 = vld [vmem:[#allocation10 + $0x10] sm:$0xff]  ;;  %v151_v7 = vld [vmem:[#allocation10 + $0x28] sm:$0xff]  ;;  %vm1784_vm0 = vmmov 0   ;;  %vm335_vm1 = vcmask 130048   ;;  %s1786_s4 = smov [#allocation16]  }
  0x82   :  { %v153_v8 = vld [vmem:[#allocation10 + $0x38] sm:$0xff]  ;;  %v1253_v9 = vpack.c.bf16 %v148_v6, %v146_v4  ;;  %v150_v11 = vld [vmem:[#allocation10 + $0x20] sm:$0xff]  ;;  %v152_v12 = vld [vmem:[#allocation10 + $0x30] sm:$0xff]  ;;  %1227 = vmatprep.mubr.msk.f32.mxu1 %vm1784_vm0, %v1782_v0  ;;  %s1087_s3 = sshll.u32 %s1786_s4, 4  ;;  %s1088_s3 = int_to_ptr.vmem [resolvable:$true] %s1087_s3 }
  0x83   :  { %v1255_v10 = vpack.c.bf16 %v153_v8, %v151_v7  ;;  %v155_v13 = vld [vmem:[#allocation10 + $0x48] sm:$0xff]  ;;  %1252 = vmatprep.subr.bf16.mxu0 %v1251_v5  ;;  %v157_v14 = vld [vmem:[#allocation10 + $0x58] sm:$0xff]  ;;  %v1257_v15 = vpack.c.bf16 %v152_v12, %v150_v11  ;;  %v154_v17 = vld [vmem:[#allocation10 + $0x40] sm:$0xff] }
  0x84   :  { %1254 = vmatpush1.bf16.msra.mxu0 %v1253_v9  ;;  %v1259_v16 = vpack.c.bf16 %v157_v14, %v155_v13  ;;  %v156_v18 = vld [vmem:[#allocation10 + $0x50] sm:$0xff]  ;;  %v159_v19 = vld [vmem:[#allocation10 + $0x68] sm:$0xff]  ;;  %v161_v20 = vld [vmem:[#allocation10 + $0x78] sm:$0xff] }
  0x85   :  { %1256 = vmatprep.subr.bf16.mxu0 %v1255_v10  ;;  %v1261_v21 = vpack.c.bf16 %v156_v18, %v154_v17  ;;  %v1263_v22 = vpack.c.bf16 %v161_v20, %v159_v19  ;;  %v158_v23 = vld [vmem:[#allocation10 + $0x60] sm:$0xff]  ;;  %v160_v24 = vld [vmem:[#allocation10 + $0x70] sm:$0xff]  ;;  %v163_v25 = vld [vmem:[#allocation10 + $0x88] sm:$0xff] }
  0x86   :  { %v165_v26 = vld [vmem:[#allocation10 + $0x98] sm:$0xff]  ;;  %v263_v27 = vld [vmem:[#allocation7] sm:$0xff]  ;;  %v264_v28 = vld [vmem:[#allocation7 + $0x8] sm:$0xff]  ;;  %v1265_v29 = vpack.c.bf16 %v160_v24, %v158_v23 }
  0x87   :  { %v1284_v30 = vpack.c.bf16 %v264_v28, %v263_v27  ;;  %v1267_v31 = vpack.c.bf16 %v165_v26, %v163_v25  ;;  %v162_v32 = vld [vmem:[#allocation10 + $0x80] sm:$0xff]  ;;  %v164_v33 = vld [vmem:[#allocation10 + $0x90] sm:$0xff]  ;;  %v167_v34 = vld [vmem:[#allocation10 + $0xa8] sm:$0xff] }
  0x88   :  { %1258 = vmatpush1.bf16.msra.mxu0 %v1257_v15  ;;  %v169_v35 = vld [vmem:[#allocation10 + $0xb8] sm:$0xff]  ;;  %v1269_v36 = vpack.c.bf16 %v164_v33, %v162_v32  ;;  %v166_v38 = vld [vmem:[#allocation10 + $0xa0] sm:$0xff]  ;;  %v168_v39 = vld [vmem:[#allocation10 + $0xb0] sm:$0xff] }
  0x89   :  { %1260 = vmatprep.subr.bf16.mxu0 %v1259_v16  ;;  %1285 = vmatpush3.bf16.xpose.msra.mxu1 %v1284_v30  ;;  %v1271_v37 = vpack.c.bf16 %v169_v35, %v167_v34  ;;  %v171_v40 = vld [vmem:[#allocation10 + $0xc8] sm:$0xff]  ;;  %v173_v41 = vld [vmem:[#allocation10 + $0xd8] sm:$0xff]  ;;  %v1273_v42 = vpack.c.bf16 %v168_v39, %v166_v38  ;;  %v170_v44 = vld [vmem:[#allocation10 + $0xc0] sm:$0xff] }
  0x8a   :  { %1286 = vmatprep.subr.bf16.mxu1 %v1783_v1  ;;  %v1275_v43 = vpack.c.bf16 %v173_v41, %v171_v40  ;;  %v172_v45 = vld [vmem:[#allocation10 + $0xd0] sm:$0xff]  ;;  %v175_v46 = vld [vmem:[#allocation10 + $0xe8] sm:$0xff]  ;;  %v177_v47 = vld [vmem:[#allocation10 + $0xf8] sm:$0xff] }
  0x8b   :  { %v1277_v48 = vpack.c.bf16 %v172_v45, %v170_v44  ;;  %v1279_v49 = vpack.c.bf16 %v177_v47, %v175_v46  ;;  %v174_v50 = vld [vmem:[#allocation10 + $0xe0] sm:$0xff]  ;;  %v176_v51 = vld [vmem:[#allocation10 + $0xf0] sm:$0xff]  ;;  %v1962_v53 = vld [vmem:[#allocation4] sm:$0xff] }
  0x8c   :  { %1262 = vmatpush1.bf16.msra.mxu0 %v1261_v21  ;;  %v1281_v52 = vpack.c.bf16 %v176_v51, %v174_v50  ;;  %v422_v54 = vld [vmem:[#allocation12 + $0x18] sm:$0xff]  ;;  %v421_v57 = vld [vmem:[#allocation12 + $0x10] sm:$0xff] }
  0x8d   :  { %1264 = vmatprep.subr.bf16.mxu0 %v1263_v22  ;;  %v426_v55 = vld [vmem:[#allocation12 + $0x38] sm:$0xff]  ;;  %v425_v58 = vld [vmem:[#allocation12 + $0x30] sm:$0xff] }
  0x8e   :  { %v1353_v56 = vpack.c.bf16 %v426_v55, %v422_v54  ;;  %v1355_v59 = vpack.c.bf16 %v425_v58, %v421_v57  ;;  %v430_v60 = vld [vmem:[#allocation12 + $0x58] sm:$0xff]  ;;  %v429_v63 = vld [vmem:[#allocation12 + $0x50] sm:$0xff] }
  0x8f   :  { %v434_v61 = vld [vmem:[#allocation12 + $0x78] sm:$0xff]  ;;  %v433_v2 = vld [vmem:[#allocation12 + $0x70] sm:$0xff] }
  0x90   :  { %1266 = vmatpush1.bf16.msra.mxu0 %v1265_v29  ;;  %v1357_v62 = vpack.c.bf16 %v434_v61, %v430_v60  ;;  %v1359_v3 = vpack.c.bf16 %v433_v2, %v429_v63  ;;  %v438_v4 = vld [vmem:[#allocation12 + $0x98] sm:$0xff]  ;;  %v437_v7 = vld [vmem:[#allocation12 + $0x90] sm:$0xff] }
  0x91   :  { %1268 = vmatprep.subr.bf16.mxu0 %v1267_v31  ;;  %v442_v5 = vld [vmem:[#allocation12 + $0xb8] sm:$0xff]  ;;  %v441_v8 = vld [vmem:[#allocation12 + $0xb0] sm:$0xff] }
  0x92   :  { %v1361_v6 = vpack.c.bf16 %v442_v5, %v438_v4  ;;  %v1363_v9 = vpack.c.bf16 %v441_v8, %v437_v7  ;;  %v446_v10 = vld [vmem:[#allocation12 + $0xd8] sm:$0xff]  ;;  %v445_v13 = vld [vmem:[#allocation12 + $0xd0] sm:$0xff] }
  0x93   :  { %v450_v11 = vld [vmem:[#allocation12 + $0xf8] sm:$0xff]  ;;  %v449_v14 = vld [vmem:[#allocation12 + $0xf0] sm:$0xff] }
  0x94   :  { %1270 = vmatpush1.bf16.msra.mxu0 %v1269_v36  ;;  %v1365_v12 = vpack.c.bf16 %v450_v11, %v446_v10  ;;  %v1367_v15 = vpack.c.bf16 %v449_v14, %v445_v13  ;;  %v454_v16 = vld [vmem:[#allocation12 + $0x118] sm:$0xff]  ;;  %v453_v19 = vld [vmem:[#allocation12 + $0x110] sm:$0xff]  ;;  %v420_v13 = vld [vmem:[#allocation12 + $0x8] sm:$0xff] }
  0x95   :  { %1272 = vmatprep.subr.bf16.mxu0 %v1271_v37  ;;  %v458_v17 = vld [vmem:[#allocation12 + $0x138] sm:$0xff]  ;;  %v457_v20 = vld [vmem:[#allocation12 + $0x130] sm:$0xff]  ;;  %v424_v14 = vld [vmem:[#allocation12 + $0x28] sm:$0xff] }
  0x96   :  { %v1369_v18 = vpack.c.bf16 %v458_v17, %v454_v16  ;;  %v1371_v21 = vpack.c.bf16 %v457_v20, %v453_v19  ;;  %v462_v22 = vld [vmem:[#allocation12 + $0x158] sm:$0xff]  ;;  %v461_v25 = vld [vmem:[#allocation12 + $0x150] sm:$0xff]  ;;  %v1289_v20 = vpack.c.bf16 %v424_v14, %v420_v13 }
  0x97   :  { %v466_v23 = vld [vmem:[#allocation12 + $0x178] sm:$0xff]  ;;  %v465_v26 = vld [vmem:[#allocation12 + $0x170] sm:$0xff] }
  0x98   :  { %1274 = vmatpush1.bf16.msra.mxu0 %v1273_v42  ;;  %v1373_v24 = vpack.c.bf16 %v466_v23, %v462_v22  ;;  %v1375_v27 = vpack.c.bf16 %v465_v26, %v461_v25  ;;  %v470_v28 = vld [vmem:[#allocation12 + $0x198] sm:$0xff]  ;;  %v469_v31 = vld [vmem:[#allocation12 + $0x190] sm:$0xff]  ;;  %v423_v25 = vld [vmem:[#allocation12 + $0x20] sm:$0xff] }
  0x99   :  { %1276 = vmatprep.subr.bf16.mxu0 %v1275_v43  ;;  %v474_v29 = vld [vmem:[#allocation12 + $0x1b8] sm:$0xff]  ;;  %v473_v32 = vld [vmem:[#allocation12 + $0x1b0] sm:$0xff] }
  0x9a   :  { %v1377_v30 = vpack.c.bf16 %v474_v29, %v470_v28  ;;  %v1379_v33 = vpack.c.bf16 %v473_v32, %v469_v31  ;;  %v478_v34 = vld [vmem:[#allocation12 + $0x1d8] sm:$0xff]  ;;  %v477_v37 = vld [vmem:[#allocation12 + $0x1d0] sm:$0xff]  ;;  %v432_v28 = vld [vmem:[#allocation12 + $0x68] sm:$0xff] }
  0x9b   :  { %v482_v35 = vld [vmem:[#allocation12 + $0x1f8] sm:$0xff]  ;;  %v481_v38 = vld [vmem:[#allocation12 + $0x1f0] sm:$0xff]  ;;  %v427_v31 = vld [vmem:[#allocation12 + $0x40] sm:$0xff] }
  0x9c   :  { %1278 = vmatpush1.bf16.msra.mxu0 %v1277_v48  ;;  %v1381_v36 = vpack.c.bf16 %v482_v35, %v478_v34  ;;  %v1383_v39 = vpack.c.bf16 %v481_v38, %v477_v37  ;;  %v486_v40 = vld [vmem:[#allocation12 + $0x218] sm:$0xff]  ;;  %v485_v43 = vld [vmem:[#allocation12 + $0x210] sm:$0xff]  ;;  %v431_v32 = vld [vmem:[#allocation12 + $0x60] sm:$0xff] }
  0x9d   :  { %1280 = vmatprep.subr.bf16.mxu0 %v1279_v49  ;;  %v490_v41 = vld [vmem:[#allocation12 + $0x238] sm:$0xff]  ;;  %v489_v44 = vld [vmem:[#allocation12 + $0x230] sm:$0xff]  ;;  %v440_v34 = vld [vmem:[#allocation12 + $0xa8] sm:$0xff]  ;;  %v1295_v35 = vpack.c.bf16 %v431_v32, %v427_v31 }
  0x9e   :  { %v1385_v42 = vpack.c.bf16 %v490_v41, %v486_v40  ;;  %v1387_v45 = vpack.c.bf16 %v489_v44, %v485_v43  ;;  %v494_v46 = vld [vmem:[#allocation12 + $0x258] sm:$0xff]  ;;  %v493_v49 = vld [vmem:[#allocation12 + $0x250] sm:$0xff]  ;;  %v435_v37 = vld [vmem:[#allocation12 + $0x80] sm:$0xff] }
  0x9f   :  { %v498_v47 = vld [vmem:[#allocation12 + $0x278] sm:$0xff]  ;;  %v497_v50 = vld [vmem:[#allocation12 + $0x270] sm:$0xff]  ;;  %v439_v38 = vld [vmem:[#allocation12 + $0xa0] sm:$0xff] }
  0xa0   :  { %1282 = vmatpush1.bf16.msra.mxu0 %v1281_v52  ;;  %v1389_v48 = vpack.c.bf16 %v498_v47, %v494_v46  ;;  %v1391_v51 = vpack.c.bf16 %v497_v50, %v493_v49  ;;  %v502_v52 = vld [vmem:[#allocation12 + $0x298] sm:$0xff]  ;;  %v505_v57 = vld [vmem:[#allocation12 + $0x2b0] sm:$0xff]  ;;  %v448_v40 = vld [vmem:[#allocation12 + $0xe8] sm:$0xff]  ;;  %v1299_v41 = vpack.c.bf16 %v439_v38, %v435_v37 }
  0xa1   :  { %1354 = vmatprep.subr.bf16.mxu0 %v1353_v56  ;;  %v506_v54 = vld [vmem:[#allocation12 + $0x2b8] sm:$0xff]  ;;  %v501_v56 = vld [vmem:[#allocation12 + $0x290] sm:$0xff]  ;;  %v443_v43 = vld [vmem:[#allocation12 + $0xc0] sm:$0xff] }
  0xa2   :  { %v1393_v55 = vpack.c.bf16 %v506_v54, %v502_v52  ;;  %v1395_v58 = vpack.c.bf16 %v505_v57, %v501_v56  ;;  %v514_v60 = vld [vmem:[#allocation12 + $0x2f8] sm:$0xff]  ;;  %v513_v63 = vld [vmem:[#allocation12 + $0x2f0] sm:$0xff]  ;;  %v447_v44 = vld [vmem:[#allocation12 + $0xe0] sm:$0xff] }
  0xa3   :  { %255 = vmatmul.mubr.f32.vlgmr.msra.gmra.mrb[0].mxu0 %v1962_v53  ;;  %v337_v10 = vld [vmem:[#allocation9] sm:$0xff]  ;;  %v338_v11 = vld [vmem:[#allocation9 + $0x8] sm:$0xff]  ;;  %v456_v46 = vld [vmem:[#allocation12 + $0x128] sm:$0xff]  ;;  %v1303_v47 = vpack.c.bf16 %v447_v44, %v443_v43 }
  0xa4   :  { %1356 = vmatpush1.bf16.msra.mxu0 %v1355_v59  ;;  %v510_v59 = vld [vmem:[#allocation12 + $0x2d8] sm:$0xff]  ;;  %v460_v52 = vld [vmem:[#allocation12 + $0x148] sm:$0xff]  ;;  %v517_v57 = vld [vmem:[#allocation12 + $0x310] sm:$0xff] }
  0xa5   :  { %1358 = vmatprep.subr.bf16.mxu0 %v1357_v62  ;;  %v1397_v61 = vpack.c.bf16 %v514_v60, %v510_v59  ;;  %v509_v62 = vld [vmem:[#allocation12 + $0x2d0] sm:$0xff]  ;;  %v518_v49 = vld [vmem:[#allocation12 + $0x318] sm:$0xff]  ;;  %v484_v37 = vld [vmem:[#allocation12 + $0x208] sm:$0xff] }
  0xa6   :  { %v1399_v2 = vpack.c.bf16 %v513_v63, %v509_v62  ;;  %v522_v54 = vld [vmem:[#allocation12 + $0x338] sm:$0xff]  ;;  %v545_v31 = vld [vmem:[#allocation12 + $0x3f0] sm:$0xff]  ;;  %v488_v38 = vld [vmem:[#allocation12 + $0x228] sm:$0xff] }
  0xa7   :  { %v1401_v56 = vpack.c.bf16 %v522_v54, %v518_v49  ;;  %v526_v62 = vld [vmem:[#allocation12 + $0x358] sm:$0xff]  ;;  %v492_v43 = vld [vmem:[#allocation12 + $0x248] sm:$0xff]  ;;  %v499_v54 = vld [vmem:[#allocation12 + $0x280] sm:$0xff] }
  0xa8   :  { %1360 = vmatpush1.bf16.msra.mxu0 %v1359_v3  ;;  %v180_v3 = vlaneseq  ;;  %v534_v13 = vld [vmem:[#allocation12 + $0x398] sm:$0xff]  ;;  %v496_v44 = vld [vmem:[#allocation12 + $0x268] sm:$0xff] }
  0xa9   :  { %1362 = vmatprep.subr.bf16.mxu0 %v1361_v6  ;;  %v178_v6 = vld [vmem:[%s2073_s5] sm:$0x3]  ;;  %v538_v14 = vld [vmem:[#allocation12 + $0x3b8] sm:$0xff] }
  0xaa   :  { %v1967_v4 = vshrl.u32 %v180_v3, 7  ;;  %v468_v3 = vld [vmem:[#allocation12 + $0x188] sm:$0xff] }
  0xab   :  { %v500_v49 = vld [vmem:[#allocation12 + $0x288] sm:$0xff] }
  0xac   :  { %1364 = vmatpush1.bf16.msra.mxu0 %v1363_v9  ;;  %v182_v5 = vsub.s32 0, %v1967_v4  ;;  %v186_v7 = vsub.s32 1, %v1967_v4 }
  0xad   :  { %1366 = vmatprep.subr.bf16.mxu0 %v1365_v12 }
  0xae   :  { %v183_v8 = vrot.slane %v178_v6, %v182_v5  ;;  %v187_v9 = vrot.slane %v178_v6, %v186_v7  ;;  %v530_v6 = vld [vmem:[#allocation12 + $0x378] sm:$0xff] }
  0xb0   :  { %1368 = vmatpush1.bf16.msra.mxu0 %v1367_v15 }
  0xb1   :  { %1370 = vmatprep.subr.bf16.mxu0 %v1369_v18  ;;  %v1287_v18 = vpack.c.bf16 %v338_v11, %v337_v10  ;;  %v525_v10 = vld [vmem:[#allocation12 + $0x350] sm:$0xff] }
  0xb2   :  { %v529_v11 = vld [vmem:[#allocation12 + $0x370] sm:$0xff] }
  0xb4   :  { %1372 = vmatpush1.bf16.msra.mxu0 %v1371_v21 }
  0xb5   :  { %1374 = vmatprep.subr.bf16.mxu0 %v1373_v24  ;;  %v419_v24 = vld [vmem:[#allocation12] sm:$0xff] }
  0xb6   :  { %v1291_v29 = vpack.c.bf16 %v423_v25, %v419_v24  ;;  %v537_v24 = vld [vmem:[#allocation12 + $0x3b0] sm:$0xff]  ;;  %v480_v25 = vld [vmem:[#allocation12 + $0x1e8] sm:$0xff] }
  0xb8   :  { %1376 = vmatpush1.bf16.msra.mxu0 %v1375_v27  ;;  %v428_v27 = vld [vmem:[#allocation12 + $0x48] sm:$0xff] }
  0xb9   :  { %1378 = vmatprep.subr.bf16.mxu0 %v1377_v30  ;;  %v1293_v30 = vpack.c.bf16 %v432_v28, %v428_v27  ;;  %v542_v27 = vld [vmem:[#allocation12 + $0x3d8] sm:$0xff] }
  0xba   :  { %v546_v28 = vld [vmem:[#allocation12 + $0x3f8] sm:$0xff] }
  0xbc   :  { %1380 = vmatpush1.bf16.msra.mxu0 %v1379_v33  ;;  %v436_v33 = vld [vmem:[#allocation12 + $0x88] sm:$0xff] }
  0xbd   :  { %1382 = vmatprep.subr.bf16.mxu0 %v1381_v36  ;;  %v1297_v36 = vpack.c.bf16 %v440_v34, %v436_v33  ;;  %v475_v34 = vld [vmem:[#allocation12 + $0x1c0] sm:$0xff] }
  0xc0   :  { %1384 = vmatpush1.bf16.msra.mxu0 %v1383_v39  ;;  %v444_v39 = vld [vmem:[#allocation12 + $0xc8] sm:$0xff] }
  0xc1   :  { %1386 = vmatprep.subr.bf16.mxu0 %v1385_v42  ;;  %v1301_v42 = vpack.c.bf16 %v448_v40, %v444_v39  ;;  %v1321_v40 = vpack.c.bf16 %v488_v38, %v484_v37  ;;  %v715_v38 = vld [vmem:[#allocation15] sm:$0xff] }
  0xc4   :  { %1388 = vmatpush1.bf16.msra.mxu0 %v1387_v45  ;;  %v452_v45 = vld [vmem:[#allocation12 + $0x108] sm:$0xff] }
  0xc5   :  { %1390 = vmatprep.subr.bf16.mxu0 %v1389_v48  ;;  %v451_v48 = vld [vmem:[#allocation12 + $0x100] sm:$0xff]  ;;  %v1305_v50 = vpack.c.bf16 %v456_v46, %v452_v45  ;;  %v1325_v46 = vpack.c.bf16 %v496_v44, %v492_v43  ;;  %v765_v44 = vld [vmem:[#allocation15 + $0x190] sm:$0xff] }
  0xc6   :  { %v734_v43 = vld [vmem:[#allocation15 + $0x98] sm:$0xff] }
  0xc8   :  { %1392 = vmatpush1.bf16.msra.mxu0 %v1391_v51  ;;  %v455_v51 = vld [vmem:[#allocation12 + $0x120] sm:$0xff] }
  0xc9   :  { %1394 = vmatprep.subr.bf16.mxu0 %v1393_v55  ;;  %v464_v55 = vld [vmem:[#allocation12 + $0x168] sm:$0xff]  ;;  %v1307_v60 = vpack.c.bf16 %v455_v51, %v451_v48  ;;  %v495_v48 = vld [vmem:[#allocation12 + $0x260] sm:$0xff] }
  0xca   :  { %v1309_v63 = vpack.c.bf16 %v464_v55, %v460_v52  ;;  %v503_v55 = vld [vmem:[#allocation12 + $0x2a0] sm:$0xff] }
  0xcc   :  { %1396 = vmatpush1.bf16.msra.mxu0 %v1395_v58  ;;  %v521_v58 = vld [vmem:[#allocation12 + $0x330] sm:$0xff] }
  0xcd   :  { %1398 = vmatprep.subr.bf16.mxu0 %v1397_v61  ;;  %v1403_v59 = vpack.c.bf16 %v521_v58, %v517_v57  ;;  %v459_v61 = vld [vmem:[#allocation12 + $0x140] sm:$0xff]  ;;  %v512_v57 = vld [vmem:[#allocation12 + $0x2e8] sm:$0xff]  ;;  %v1331_v58 = vpack.c.bf16 %v503_v55, %v499_v54 }
  0xd0   :  { %1400 = vmatpush1.bf16.msra.mxu0 %v1399_v2  ;;  %v463_v2 = vld [vmem:[#allocation12 + $0x160] sm:$0xff] }
  0xd1   :  { %1402 = vmatprep.subr.bf16.mxu0 %v1401_v56  ;;  %v508_v56 = vld [vmem:[#allocation12 + $0x2c8] sm:$0xff] }
  0xd4   :  { %1404 = vmatpush1.bf16.msra.mxu0 %v1403_v59  ;;  %v1333_v59 = vpack.c.bf16 %v512_v57, %v508_v56  ;;  %v749_v56 = vld [vmem:[#allocation15 + $0x110] sm:$0xff]  ;;  %v750_v57 = vld [vmem:[#allocation15 + $0x118] sm:$0xff] }
 0x176   :  { %v256_v12 = vpop.f32.mrb[0].mxu0 }
 0x177   :  { %v257_v15 = vadd.f32 %v256_v12, %v183_v8  ;;  %v258_v16 = vpop.f32.mrb[1].mxu0  ;;  %v472_v8 = vld [vmem:[#allocation12 + $0x1a8] sm:$0xff]  ;;  %v1407_v12 = vpack.c.bf16 %v529_v11, %v525_v10 }
 0x178   :  { %v259_v17 = vadd.f32 %v258_v16, %v187_v9  ;;  %v1405_v9 = vpack.c.bf16 %v530_v6, %v526_v62  ;;  %v467_v16 = vld [vmem:[#allocation12 + $0x180] sm:$0xff]  ;;  %v516_v62 = vld [vmem:[#allocation12 + $0x308] sm:$0xff] }
 0x179   :  { %v1978_v19 = vmax.f32 %v257_v15, 0.0  ;;  %v1311_v15 = vpack.c.bf16 %v463_v2, %v459_v61  ;;  %v511_v61 = vld [vmem:[#allocation12 + $0x2e0] sm:$0xff]  ;;  %v528_v10 = vld [vmem:[#allocation12 + $0x368] sm:$0xff] }
 0x17a   :  { %v1980_v21 = vmax.f32 %v259_v17, 0.0  ;;  %1406 = vmatprep.subr.bf16.mxu0 %v1405_v9  ;;  %v1409_v17 = vpack.c.bf16 %v538_v14, %v534_v13  ;;  %v515_v6 = vld [vmem:[#allocation12 + $0x300] sm:$0xff]  ;;  %v524_v9 = vld [vmem:[#allocation12 + $0x348] sm:$0xff] }
 0x17b   :  { %1228 = vmatmul.mubr.f32.vlgmr.msra.gmra.mrb[0].mxu1 %v1978_v19  ;;  %v410_v22 = vmul.f32 %v1978_v19, %v1978_v19  ;;  %1408 = vmatpush1.bf16.msra.mxu0 %v1407_v12  ;;  %v1341_v12 = vpack.c.bf16 %v528_v10, %v524_v9  ;;  %v523_v13 = vld [vmem:[#allocation12 + $0x340] sm:$0xff]  ;;  %v737_v9 = vld [vmem:[#allocation15 + $0xb0] sm:$0xff] }
 0x17c   :  { %1288 = vmatpush3.bf16.xpose.msra.mxu1 %v1287_v18  ;;  %v411_v23 = vmul.f32 %v1980_v21, %v1980_v21  ;;  %1234 = vmatprep.mubr.msk.f32.mxu1 %vm1784_vm0, %v1782_v0  ;;  %v533_v18 = vld [vmem:[#allocation12 + $0x390] sm:$0xff]  ;;  %v527_v14 = vld [vmem:[#allocation12 + $0x360] sm:$0xff] }
 0x17d   :  { %1290 = vmatprep.subr.bf16.mxu1 %v1289_v20  ;;  %v1313_v20 = vpack.c.bf16 %v472_v8, %v468_v3  ;;  %1410 = vmatprep.subr.bf16.mxu0 %v1409_v17  ;;  %v519_v8 = vld [vmem:[#allocation12 + $0x320] sm:$0xff]  ;;  %v1343_v17 = vpack.c.bf16 %v527_v14, %v523_v13 }
 0x17e   :  { %v412_v26 = vadd.f32 %v411_v23, %v410_v22  ;;  %v471_v22 = vld [vmem:[#allocation12 + $0x1a0] sm:$0xff]  ;;  %v476_v23 = vld [vmem:[#allocation12 + $0x1c8] sm:$0xff]  ;;  %v1339_v11 = vpack.c.bf16 %v519_v8, %v515_v6 }
 0x17f   :  { %v1315_v32 = vpack.c.bf16 %v471_v22, %v467_v16  ;;  %v1317_v33 = vpack.c.bf16 %v480_v25, %v476_v23  ;;  %v536_v16 = vld [vmem:[#allocation12 + $0x3a8] sm:$0xff]  ;;  %v535_v22 = vld [vmem:[#allocation12 + $0x3a0] sm:$0xff] }
 0x180   :  { %413 = vadd.xlane.f32.xlu0 %v412_v26  ;;  %v1411_v26 = vpack.c.bf16 %v537_v24, %v533_v18  ;;  %v540_v23 = vld [vmem:[#allocation12 + $0x3c8] sm:$0xff]  ;;  %v738_v10 = vld [vmem:[#allocation15 + $0xb8] sm:$0xff] }
 0x181   :  { %v544_v24 = vld [vmem:[#allocation12 + $0x3e8] sm:$0xff] }
 0x182   :  { %1412 = vmatpush1.bf16.msra.mxu0 %v1411_v26  ;;  %v1349_v26 = vpack.c.bf16 %v544_v24, %v540_v23  ;;  %v751_v6 = vld [vmem:[#allocation15 + $0x120] sm:$0xff]  ;;  %v752_v8 = vld [vmem:[#allocation15 + $0x128] sm:$0xff] }
 0x183   :  { %1235 = vmatmul.mubr.f32.vlgmr.msra.gmra.mrb[2].mxu1 %v1980_v21  ;;  %v1459_v14 = vpack.c.bf16 %v752_v8, %v751_v6  ;;  %v739_v23 = vld [vmem:[#allocation15 + $0xc0] sm:$0xff]  ;;  %v740_v24 = vld [vmem:[#allocation15 + $0xc8] sm:$0xff]  ;;  %v777_v6 = vld [vmem:[#allocation15 + $0x1f0] sm:$0xff] }
 0x184   :  { %1292 = vmatpush1.bf16.msra.mxu1 %v1291_v29  ;;  %v1413_v29 = vpack.c.bf16 %v546_v28, %v542_v27  ;;  %v539_v27 = vld [vmem:[#allocation12 + $0x3c0] sm:$0xff] }
 0x185   :  { %1294 = vmatprep.subr.bf16.mxu1 %v1293_v30  ;;  %v541_v30 = vld [vmem:[#allocation12 + $0x3d0] sm:$0xff]  ;;  %v543_v28 = vld [vmem:[#allocation12 + $0x3e0] sm:$0xff] }
 0x186   :  { %1414 = vmatprep.subr.bf16.mxu0 %v1413_v29  ;;  %v1351_v29 = vpack.c.bf16 %v543_v28, %v539_v27 }
 0x188   :  { %1296 = vmatpush1.bf16.msra.mxu1 %v1295_v35  ;;  %v479_v35 = vld [vmem:[#allocation12 + $0x1e0] sm:$0xff] }
 0x189   :  { %1298 = vmatprep.subr.bf16.mxu1 %v1297_v36  ;;  %v1415_v36 = vpack.c.bf16 %v545_v31, %v541_v30  ;;  %v1319_v39 = vpack.c.bf16 %v479_v35, %v475_v34  ;;  %v731_v30 = vld [vmem:[#allocation15 + $0x80] sm:$0xff]  ;;  %v732_v31 = vld [vmem:[#allocation15 + $0x88] sm:$0xff] }
 0x18a   :  { %v764_v34 = vld [vmem:[#allocation15 + $0x188] sm:$0xff] }
 0x18b   :  { %1416 = vmatpush1.bf16.msra.mxu0 %v1415_v36 }
 0x18c   :  { %1300 = vmatpush1.bf16.msra.mxu1 %v1299_v41  ;;  %v483_v41 = vld [vmem:[#allocation12 + $0x200] sm:$0xff] }
 0x18d   :  { %1302 = vmatprep.subr.bf16.mxu1 %v1301_v42  ;;  %v487_v42 = vld [vmem:[#allocation12 + $0x220] sm:$0xff] }
 0x18e   :  { %v1323_v45 = vpack.c.bf16 %v487_v42, %v483_v41  ;;  %v748_v41 = vld [vmem:[#allocation15 + $0x108] sm:$0xff]  ;;  %v733_v42 = vld [vmem:[#allocation15 + $0x90] sm:$0xff] }
 0x18f   :  { %v1421_v54 = vpack.c.bf16 %v734_v43, %v733_v42  ;;  %v726_v42 = vld [vmem:[#allocation15 + $0x58] sm:$0xff] }
 0x190   :  { %1304 = vmatpush1.bf16.msra.mxu1 %v1303_v47  ;;  %v491_v47 = vld [vmem:[#allocation12 + $0x240] sm:$0xff] }
 0x191   :  { %1306 = vmatprep.subr.bf16.mxu1 %v1305_v50  ;;  %v504_v50 = vld [vmem:[#allocation12 + $0x2a8] sm:$0xff]  ;;  %v1327_v51 = vpack.c.bf16 %v495_v48, %v491_v47 }
 0x192   :  { %v1329_v52 = vpack.c.bf16 %v504_v50, %v500_v49 }
 0x194   :  { %1308 = vmatpush1.bf16.msra.mxu1 %v1307_v60  ;;  %v507_v60 = vld [vmem:[#allocation12 + $0x2c0] sm:$0xff] }
 0x195   :  { %1310 = vmatprep.subr.bf16.mxu1 %v1309_v63  ;;  %v520_v63 = vld [vmem:[#allocation12 + $0x328] sm:$0xff]  ;;  %v1335_v2 = vpack.c.bf16 %v511_v61, %v507_v60 }
 0x196   :  { %v1337_v3 = vpack.c.bf16 %v520_v63, %v516_v62  ;;  %v767_v60 = vld [vmem:[#allocation15 + $0x1a0] sm:$0xff]  ;;  %v768_v61 = vld [vmem:[#allocation15 + $0x1a8] sm:$0xff] }
 0x197   :  { %v719_v62 = vld [vmem:[#allocation15 + $0x20] sm:$0xff]  ;;  %v720_v63 = vld [vmem:[#allocation15 + $0x28] sm:$0xff] }
 0x198   :  { %1312 = vmatpush1.bf16.msra.mxu1 %v1311_v15  ;;  %v532_v15 = vld [vmem:[#allocation12 + $0x388] sm:$0xff]  ;;  %v1427_v13 = vpack.c.bf16 %v720_v63, %v719_v62 }
 0x199   :  { %1314 = vmatprep.subr.bf16.mxu1 %v1313_v20  ;;  %v1345_v18 = vpack.c.bf16 %v536_v16, %v532_v15  ;;  %v531_v20 = vld [vmem:[#allocation12 + $0x380] sm:$0xff]  ;;  %v721_v15 = vld [vmem:[#allocation15 + $0x30] sm:$0xff]  ;;  %v760_v62 = vld [vmem:[#allocation15 + $0x168] sm:$0xff] }
 0x19a   :  { %v1347_v25 = vpack.c.bf16 %v535_v22, %v531_v20  ;;  %v722_v16 = vld [vmem:[#allocation15 + $0x38] sm:$0xff]  ;;  %v753_v20 = vld [vmem:[#allocation15 + $0x130] sm:$0xff] }
 0x19b   :  { %v754_v22 = vld [vmem:[#allocation15 + $0x138] sm:$0xff]  ;;  %v1431_v27 = vpack.c.bf16 %v722_v16, %v721_v15 }
 0x19c   :  { %1316 = vmatpush1.bf16.msra.mxu1 %v1315_v32  ;;  %v763_v32 = vld [vmem:[#allocation15 + $0x180] sm:$0xff]  ;;  %v1463_v28 = vpack.c.bf16 %v754_v22, %v753_v20  ;;  %v762_v15 = vld [vmem:[#allocation15 + $0x178] sm:$0xff]  ;;  %v563_v20 = vsub.s32 3, %v1967_v4 }
 0x19d   :  { %1318 = vmatprep.subr.bf16.mxu1 %v1317_v33  ;;  %v1417_v33 = vpack.c.bf16 %v732_v31, %v731_v30  ;;  %v1449_v35 = vpack.c.bf16 %v764_v34, %v763_v32  ;;  %v724_v30 = vld [vmem:[#allocation15 + $0x48] sm:$0xff]  ;;  %v1433_v31 = vpack.c.bf16 %v740_v24, %v739_v23 }
 0x19e   :  { %v756_v34 = vld [vmem:[#allocation15 + $0x148] sm:$0xff] }
 0x19f   :  { %1450 = vmatprep.subr.bf16.mxu0 %v1449_v35  ;;  %v741_v35 = vld [vmem:[#allocation15 + $0xd0] sm:$0xff] }
 0x1a0   :  { %1320 = vmatpush1.bf16.msra.mxu1 %v1319_v39  ;;  %v716_v39 = vld [vmem:[#allocation15 + $0x8] sm:$0xff] }
 0x1a1   :  { %1322 = vmatprep.subr.bf16.mxu1 %v1321_v40  ;;  %v747_v40 = vld [vmem:[#allocation15 + $0x100] sm:$0xff]  ;;  %v1419_v49 = vpack.c.bf16 %v716_v39, %v715_v38  ;;  %v774_v38 = vld [vmem:[#allocation15 + $0x1d8] sm:$0xff] }
 0x1a2   :  { %v1451_v50 = vpack.c.bf16 %v748_v41, %v747_v40  ;;  %v725_v41 = vld [vmem:[#allocation15 + $0x50] sm:$0xff] }
 0x1a4   :  { %1324 = vmatpush1.bf16.msra.mxu1 %v1323_v45  ;;  %v766_v45 = vld [vmem:[#allocation15 + $0x198] sm:$0xff] }
 0x1a5   :  { %1326 = vmatprep.subr.bf16.mxu1 %v1325_v46  ;;  %v1453_v55 = vpack.c.bf16 %v766_v45, %v765_v44  ;;  %v757_v45 = vld [vmem:[#allocation15 + $0x150] sm:$0xff] }
 0x1a8   :  { %1328 = vmatpush1.bf16.msra.mxu1 %v1327_v51  ;;  %v717_v51 = vld [vmem:[#allocation15 + $0x10] sm:$0xff] }
 0x1a9   :  { %1330 = vmatprep.subr.bf16.mxu1 %v1329_v52  ;;  %v718_v52 = vld [vmem:[#allocation15 + $0x18] sm:$0xff] }
 0x1ac   :  { %1332 = vmatpush1.bf16.msra.mxu1 %v1331_v58  ;;  %v735_v58 = vld [vmem:[#allocation15 + $0xa0] sm:$0xff] }
 0x1ad   :  { %1334 = vmatprep.subr.bf16.mxu1 %v1333_v59  ;;  %v736_v59 = vld [vmem:[#allocation15 + $0xa8] sm:$0xff] }
 0x1b0   :  { %1336 = vmatpush1.bf16.msra.mxu1 %v1335_v2  ;;  %v1425_v2 = vpack.c.bf16 %v736_v59, %v735_v58 }
 0x1b1   :  { %1338 = vmatprep.subr.bf16.mxu1 %v1337_v3  ;;  %v1457_v3 = vpack.c.bf16 %v768_v61, %v767_v60  ;;  %v727_v60 = vld [vmem:[#allocation15 + $0x60] sm:$0xff]  ;;  %v728_v61 = vld [vmem:[#allocation15 + $0x68] sm:$0xff] }
 0x1b4   :  { %1340 = vmatpush1.bf16.msra.mxu1 %v1339_v11  ;;  %v769_v11 = vld [vmem:[#allocation15 + $0x1b0] sm:$0xff] }
 0x1b5   :  { %1342 = vmatprep.subr.bf16.mxu1 %v1341_v12  ;;  %v770_v12 = vld [vmem:[#allocation15 + $0x1b8] sm:$0xff] }
 0x1b8   :  { %1344 = vmatpush1.bf16.msra.mxu1 %v1343_v17  ;;  %v1429_v17 = vpack.c.bf16 %v738_v10, %v737_v9  ;;  %v778_v9 = vld [vmem:[#allocation15 + $0x1f8] sm:$0xff]  ;;  %v729_v10 = vld [vmem:[#allocation15 + $0x70] sm:$0xff] }
 0x1b9   :  { %1346 = vmatprep.subr.bf16.mxu1 %v1345_v18  ;;  %v1461_v18 = vpack.c.bf16 %v770_v12, %v769_v11  ;;  %v730_v11 = vld [vmem:[#allocation15 + $0x78] sm:$0xff]  ;;  %v1477_v12 = vpack.c.bf16 %v778_v9, %v777_v6 }
 0x1bc   :  { %1348 = vmatpush1.bf16.msra.mxu1 %v1347_v25  ;;  %v771_v25 = vld [vmem:[#allocation15 + $0x1c0] sm:$0xff] }
 0x1bd   :  { %1350 = vmatprep.subr.bf16.mxu1 %v1349_v26  ;;  %v772_v26 = vld [vmem:[#allocation15 + $0x1c8] sm:$0xff] }
 0x1be   :  { %v1465_v32 = vpack.c.bf16 %v772_v26, %v771_v25 }
 0x1c0   :  { %1352 = vmatpush1.bf16.msra.mxu1 %v1351_v29  ;;  %v723_v29 = vld [vmem:[#allocation15 + $0x40] sm:$0xff] }
 0x1c1   :  { %1418 = vmatprep.subr.bf16.mxu1 %v1417_v33  ;;  %v755_v33 = vld [vmem:[#allocation15 + $0x140] sm:$0xff]  ;;  %v1435_v39 = vpack.c.bf16 %v724_v30, %v723_v29 }
 0x1c2   :  { %v1467_v40 = vpack.c.bf16 %v756_v34, %v755_v33 }
 0x20d   :  { %v414_v36 = vpop.xlane.xlu0 %413 }
 0x20e   :  { %v415_v37 = vadd.f32 1e-12, %v414_v36  ;;  %v742_v36 = vld [vmem:[#allocation15 + $0xd8] sm:$0xff] }
 0x20f   :  { %v1437_v43 = vpack.c.bf16 %v742_v36, %v741_v35 }
 0x210   :  { %1507 = vrsqrt.f32 %v415_v37  ;;  %v773_v37 = vld [vmem:[#allocation15 + $0x1d0] sm:$0xff] }
 0x211   :  { %v1469_v44 = vpack.c.bf16 %v774_v38, %v773_v37  ;;  %v1140_v38 = vld [vmem:[%s2077_s9] ss:$0 sm:$0xff] }
 0x21a   :  { %v1508_v46 = vpop.eup %1507 }
 0x21b   :  { %v418_v47 = vmul.f32 %v1508_v46, %v1980_v21  ;;  %v417_v48 = vmul.f32 %v1508_v46, %v1978_v19  ;;  %v1423_v21 = vpack.c.bf16 %v718_v52, %v717_v51  ;;  %v1455_v19 = vpack.c.bf16 %v750_v57, %v749_v56  ;;  %v758_v46 = vld [vmem:[#allocation15 + $0x158] sm:$0xff] }
 0x21c   :  { %v1439_v51 = vpack.c.bf16 %v726_v42, %v725_v41  ;;  %v1471_v52 = vpack.c.bf16 %v758_v46, %v757_v45 }
 0x21d   :  { %633 = vmatprep.mubr.f32.mxu1 %v418_v47  ;;  %704 = vmatprep.mubr.f32.mxu0 %v418_v47  ;;  %v743_v47 = vld [vmem:[#allocation15 + $0xe0] sm:$0xff] }
 0x21e   :  { %634 = vmatmul.mubr.f32.vlgmr.msra.gmra.mrb[4].mxu1 %v417_v48  ;;  %705 = vmatmul.mubr.f32.vlgmr.msra.gmra.mrb[2].mxu0 %v417_v48  ;;  %v744_v48 = vld [vmem:[#allocation15 + $0xe8] sm:$0xff] }
 0x21f   :  { %1420 = vmatpush3.bf16.msra.mxu1 %v1419_v49  ;;  %1452 = vmatpush3.bf16.msra.mxu0 %v1451_v50  ;;  %v775_v49 = vld [vmem:[#allocation15 + $0x1e0] sm:$0xff]  ;;  %v776_v50 = vld [vmem:[#allocation15 + $0x1e8] sm:$0xff] }
 0x220   :  { %1422 = vmatprep.subr.bf16.mxu1 %v1421_v54  ;;  %1454 = vmatprep.subr.bf16.mxu0 %v1453_v55  ;;  %v1441_v54 = vpack.c.bf16 %v744_v48, %v743_v47  ;;  %v1473_v55 = vpack.c.bf16 %v776_v50, %v775_v49  ;;  %v934_v48 = vld [vmem:[%s2069_s1] sm:$0xff]  ;;  %v935_v49 = vld [vmem:[%s2069_s1 + $0x8] sm:$0xff]  ;;  %s1785_s1 = smov [#allocation17]  }
 0x221   :  { %v1482_v50 = vpack.c.bf16 %v935_v49, %v934_v48  ;;  %s1097_s9 = sshll.u32 %s1785_s1, 4  ;;  %s1098_s9 = int_to_ptr.vmem [resolvable:$true] %s1097_s9 }
 0x222   :  { %s1667_s30 = scalar_lea.vmem %s1098_s9, 128  ;;  %p1672_p1 = scmp.lt.s32.totalorder %s1098_s9, %s1098_s9 }
 0x223   :  { %1424 = vmatpush3.bf16.msra.mxu1 %v1423_v21  ;;  %1456 = vmatpush3.bf16.msra.mxu0 %v1455_v19  ;;  %v759_v21 = vld [vmem:[#allocation15 + $0x160] sm:$0xff]  ;;  %v1443_v19 = vpack.c.bf16 %v728_v61, %v727_v60  ;;  %p1668_p0 = scmp.ne.s32.totalorder %s1098_s9, %s1667_s30  ;;  %p1673_p2 = scmp.lt.s32.totalorder %s1667_s30, %s1667_s30 }
 0x224   :  { %1426 = vmatprep.subr.bf16.mxu1 %v1425_v2  ;;  %1458 = vmatprep.subr.bf16.mxu0 %v1457_v3  ;;  %v1475_v63 = vpack.c.bf16 %v760_v62, %v759_v21  ;;  %v745_v2 = vld [vmem:[#allocation15 + $0xf0] sm:$0xff]  ;;  %v746_v3 = vld [vmem:[#allocation15 + $0xf8] sm:$0xff] }
 0x225   :  { %v1445_v8 = vpack.c.bf16 %v746_v3, %v745_v2  ;;  %p1674_p3 = por %p1673_p2, %p1672_p1 }
 0x227   :  { %1428 = vmatpush3.bf16.msra.mxu1 %v1427_v13  ;;  %1460 = vmatpush3.bf16.msra.mxu0 %v1459_v14  ;;  %v1447_v13 = vpack.c.bf16 %v730_v11, %v729_v10  ;;  %v761_v14 = vld [vmem:[#allocation15 + $0x170] sm:$0xff]  ;;  %p1675_p4 = pnand %p1674_p3, %p1668_p0 }
 0x228   :  { %1430 = vmatprep.subr.bf16.mxu1 %v1429_v17  ;;  %1462 = vmatprep.subr.bf16.mxu0 %v1461_v18  ;;  %v1479_v16 = vpack.c.bf16 %v762_v15, %v761_v14  ;;  %v559_v17 = vsub.s32 2, %v1967_v4  ;;  %v547_v18 = vld [vmem:[#allocation13] sm:$0xf]  ;;  %v138_v4 = vmul.f32 %v1962_v53, %v1962_v53 }
 0x229   :  { %v552_v22 = vrot.slane %v547_v18, %v182_v5  ;;  %v556_v24 = vrot.slane %v547_v18, %v186_v7  ;;  %v564_v25 = vrot.slane %v547_v18, %v563_v20 }
 0x22a   :  { %v560_v23 = vrot.slane %v547_v18, %v559_v17  ;;  %139 = vadd.xlane.f32.xlu0 %v138_v4 }
 0x22b   :  { %1432 = vmatpush3.bf16.msra.mxu1 %v1431_v27  ;;  %1464 = vmatpush3.bf16.msra.mxu0 %v1463_v28 }
 0x22c   :  { %1434 = vmatprep.subr.bf16.mxu1 %v1433_v31  ;;  %1466 = vmatprep.subr.bf16.mxu0 %v1465_v32 }
 0x22f   :  { %1436 = vmatpush3.bf16.msra.mxu1 %v1435_v39  ;;  %1468 = vmatpush3.bf16.msra.mxu0 %v1467_v40 }
 0x230   :  { %1438 = vmatprep.subr.bf16.mxu1 %v1437_v43  ;;  %1470 = vmatprep.subr.bf16.mxu0 %v1469_v44 }
 0x233   :  { %1440 = vmatpush3.bf16.msra.mxu1 %v1439_v51  ;;  %1472 = vmatpush3.bf16.msra.mxu0 %v1471_v52 }
 0x234   :  { %1442 = vmatprep.subr.bf16.mxu1 %v1441_v54  ;;  %1474 = vmatprep.subr.bf16.mxu0 %v1473_v55 }
 0x237   :  { %1444 = vmatpush3.bf16.msra.mxu1 %v1443_v19  ;;  %1476 = vmatpush3.bf16.msra.mxu0 %v1475_v63 }
 0x238   :  { %1446 = vmatprep.subr.bf16.mxu1 %v1445_v8  ;;  %1478 = vmatprep.subr.bf16.mxu0 %v1477_v12 }
 0x23b   :  { %1448 = vmatpush3.bf16.msra.mxu1 %v1447_v13  ;;  %1480 = vmatpush3.bf16.msra.mxu0 %v1479_v16 }
 0x23c   :  { %1481 = vmatprep.subr.bf16.mxu1 %v1783_v1 }
 0x24e   :  { %v331_v56 = vpop.f32.mrb[0].mxu1 }
 0x24f   :  { %v1229_v57 = vpop.f32.mrb[1].mxu1  ;;  %336 = vst.msk [vmem:[#allocation17] sm:$0xff] %vm335_vm1, %v331_v56 }
 0x256   :  { %v405_v58 = vpop.f32.mrb[2].mxu1 }
 0x257   :  { %409 = vst.msk [vmem:[#allocation19] sm:$0xff] %vm335_vm1, %v405_v58  ;;  %v1236_v59 = vpop.f32.mrb[3].mxu1 }
 0x2b7   :  { %v140_v46 = vpop.xlane.xlu0 %139 }
 0x2b8   :  { %v141_v47 = vadd.f32 1e-12, %v140_v46 }
 0x2ba   :  { %1509 = vrsqrt.f32 %v141_v47 }
 0x2c4   :  { %v1510_v51 = vpop.eup %1509 }
 0x2c5   :  { %v143_v52 = vmul.f32 14.285714, %v1510_v51 }
 0x2c7   :  { %v144_v54 = vmul.f32 %v143_v52, %v1962_v53 }
 0x2f1   :  { %v635_v26 = vpop.f32.mrb[4].mxu1  ;;  %v706_v27 = vpop.f32.mrb[2].mxu0 }
 0x2f2   :  { %v636_v28 = vadd.f32 %v635_v26, %v552_v22  ;;  %v707_v29 = vadd.f32 %v706_v27, %v560_v23  ;;  %v637_v30 = vpop.f32.mrb[5].mxu1  ;;  %v708_v31 = vpop.f32.mrb[3].mxu0 }
 0x2f3   :  { %v638_v32 = vadd.f32 %v637_v30, %v556_v24  ;;  %v709_v33 = vadd.f32 %v708_v31, %v564_v25 }
 0x2f4   :  { %v711_v36 = vmax.f32 %v636_v28, 0.0  ;;  %v713_v37 = vmax.f32 %v707_v29, 0.0 }
 0x2f5   :  { %v712_v34 = vmax.f32 %v638_v32, 0.0  ;;  %v714_v35 = vmax.f32 %v709_v33, 0.0 }
 0x2f7   :  { %850 = vmatprep.mubr.f32.mxu1 %v712_v34  ;;  %920 = vmatprep.mubr.f32.mxu0 %v714_v35 }
 0x2f8   :  { %851 = vmatmul.mubr.f32.vlgmr.msra.gmra.mrb[6].mxu1 %v711_v36  ;;  %921 = vmatmul.mubr.f32.vlgmr.msra.gmra.mrb[4].mxu0 %v713_v37 }
 0x2f9   :  { %1241 = vmatprep.mubr.msk.f32.mxu1 %vm1784_vm0, %v1782_v0  ;;  %1483 = vmatpush3.bf16.xpose.msra.mxu1 %v1482_v50 }
 0x2fa   :  { %1484 = vmatprep.subr.bf16.mxu1 %v1783_v1 }
 0x300   :  { %1242 = vmatmul.mubr.f32.vlgmr.msra.gmra.mrb[8].mxu1 %v144_v54 }
 0x301   :  { %1486 = vmatpush3.bf16.xpose.msra.mxu1 %v1482_v50  ;;  %1248 = vmatprep.mubr.msk.f32.mxu1 %vm1784_vm0, %v1782_v0 }
 0x3cb   :  { %v1179_v5 = vpop.f32.mrb[6].mxu1  ;;  %v1214_v7 = vpop.f32.mrb[4].mxu0 }
 0x3cc   :  { %v1180_v39 = vpop.f32.mrb[7].mxu1  ;;  %v1215_v40 = vpop.f32.mrb[5].mxu0 }
 0x3cd   :  { %v1181_v41 = vadd.f32 %v1180_v39, %v1179_v5  ;;  %v1216_v42 = vadd.f32 %v1215_v40, %v1214_v7 }
 0x3cf   :  { %v853_v43 = vadd.f32 %v1181_v41, %v1140_v38 }
 0x3d1   :  { %v923_v44 = vadd.f32 %v1216_v42, %v853_v43 }
 0x3d3   :  { %v926_v45 = vmul.f32 %v923_v44, %v923_v44  ;;  %v1003_v60 = vpop.f32.mrb[8].mxu1 }
 0x3d4   :  { %1008 = vst.msk [vmem:[#allocation16] sm:$0xff] %vm335_vm1, %v1003_v60  ;;  %v1243_v1 = vpop.f32.mrb[9].mxu1 }
 0x3d5   :  { %927 = vadd.xlane.f32.xlu1 %v926_v45 }
 0x462   :  { %v928_v55 = vpop.xlane.xlu1 %927 }
 0x463   :  { %v929_v56 = vadd.f32 1e-12, %v928_v55 }
 0x465   :  { %1511 = vrsqrt.f32 %v929_v56 }
 0x46f   :  { %v1512_v57 = vpop.eup %1511 }
 0x470   :  { %v931_v58 = vmul.f32 14.285714, %v1512_v57 }
 0x472   :  { %v932_v59 = vmul.f32 %v931_v58, %v923_v44 }
 0x474   :  { %1249 = vmatmul.mubr.f32.vlgmr.msra.gmra.mrb[10].mxu1 %v932_v59 }
 0x475   :  { %1678 = shalt.err (!%p1675_p4)
}
 0x476   :  { %s1679_s26 = scalar_lea.hbm %s2079_s11, 128 }
 0x477   :  { %p1680_p5 = scmp.ne.s32.totalorder %s2079_s11, %s1679_s26  ;;  %p1683_p6 = scmp.lt.u32.totalorder %s1679_s26, %s2079_s11 }
 0x479   :  { %p1685_p7 = pnand %p1683_p6, %p1680_p5 }
 0x47b   :  { %1688 = shalt.err (!%p1685_p7)
}
 0x47c   :  { %1100 = dma.vmem_to_hbm [thread:$0]  %s1098_s9, 128, %s2079_s11, [#allocation18]  }
 0x47d   :  { %s1689_s25 = scalar_lea.vmem %s1088_s3, 128  ;;  %p1694_p9 = scmp.lt.s32.totalorder %s1088_s3, %s1088_s3 }
 0x47e   :  { %p1690_p8 = scmp.ne.s32.totalorder %s1088_s3, %s1689_s25  ;;  %p1695_p10 = scmp.lt.s32.totalorder %s1689_s25, %s1689_s25 }
 0x480   :  { %p1696_p11 = por %p1695_p10, %p1694_p9 }
 0x482   :  { %p1697_p12 = pnand %p1696_p11, %p1690_p8 }
 0x484   :  { %1700 = shalt.err (!%p1697_p12)
}
 0x485   :  { %s1701_s6 = scalar_lea.hbm %s2078_s10, 128 }
 0x486   :  { %p1702_p13 = scmp.ne.s32.totalorder %s2078_s10, %s1701_s6  ;;  %p1705_p0 = scmp.lt.u32.totalorder %s1701_s6, %s2078_s10 }
 0x488   :  { %p1707_p1 = pnand %p1705_p0, %p1702_p13 }
 0x48a   :  { %1710 = shalt.err (!%p1707_p1)
}
 0x48b   :  { %1090 = dma.vmem_to_hbm [thread:$0]  %s1088_s3, 128, %s2078_s10, [#allocation6]  }
 0x48c   :  { %s1787_s7 = smov [#allocation19]  }
 0x48d   :  { %s1107_s21 = sshll.u32 %s1787_s7, 4  ;;  %s1108_s21 = int_to_ptr.vmem [resolvable:$true] %s1107_s21 }
 0x48e   :  { %s1711_s29 = scalar_lea.vmem %s1108_s21, 128  ;;  %p1716_p3 = scmp.lt.s32.totalorder %s1108_s21, %s1108_s21 }
 0x48f   :  { %p1712_p2 = scmp.ne.s32.totalorder %s1108_s21, %s1711_s29  ;;  %p1717_p4 = scmp.lt.s32.totalorder %s1711_s29, %s1711_s29 }
 0x491   :  { %p1718_p5 = por %p1717_p4, %p1716_p3 }
 0x493   :  { %p1719_p6 = pnand %p1718_p5, %p1712_p2 }
 0x495   :  { %1722 = shalt.err (!%p1719_p6)
}
 0x496   :  { %s1723_s9 = scalar_lea.hbm %s2080_s12, 128 }
 0x497   :  { %p1724_p7 = scmp.ne.s32.totalorder %s2080_s12, %s1723_s9  ;;  %p1727_p8 = scmp.lt.u32.totalorder %s1723_s9, %s2080_s12 }
 0x499   :  { %p1729_p9 = pnand %p1727_p8, %p1724_p7 }
 0x49b   :  { %1732 = shalt.err (!%p1729_p9)
}
 0x49c   :  { %1110 = dma.vmem_to_hbm [thread:$0]  %s1108_s21, 128, %s2080_s12, [#allocation18]  }
 0x49d   :  { %s1788_s26 = smov [#allocation20]  }
 0x49e   :  { %s1117_s16 = sshll.u32 %s1788_s26, 4  ;;  %s1118_s16 = int_to_ptr.vmem [resolvable:$true] %s1117_s16 }
 0x49f   :  { %s1733_s17 = scalar_lea.vmem %s1118_s16, 128  ;;  %p1738_p11 = scmp.lt.s32.totalorder %s1118_s16, %s1118_s16 }
 0x4a0   :  { %p1734_p10 = scmp.ne.s32.totalorder %s1118_s16, %s1733_s17  ;;  %p1739_p12 = scmp.lt.s32.totalorder %s1733_s17, %s1733_s17 }
 0x4a2   :  { %p1740_p13 = por %p1739_p12, %p1738_p11 }
 0x4a4   :  { %p1741_p0 = pnand %p1740_p13, %p1734_p10 }
 0x547   :  { %v1076_v0 = vpop.f32.mrb[10].mxu1 }
 0x548   :  { %1080 = vst.msk [vmem:[#allocation20] sm:$0xff] %vm335_vm1, %v1076_v0  ;;  %v1250_v53 = vpop.f32.mrb[11].mxu1 }
 0x549   :  { %1744 = shalt.err (!%p1741_p0)
}
 0x54a   :  { %s1745_s24 = scalar_lea.hbm %s2081_s13, 128 }
 0x54b   :  { %p1746_p1 = scmp.ne.s32.totalorder %s2081_s13, %s1745_s24  ;;  %p1749_p2 = scmp.lt.u32.totalorder %s1745_s24, %s2081_s13 }
 0x54d   :  { %p1751_p3 = pnand %p1749_p2, %p1746_p1 }
 0x54f   :  { %1754 = shalt.err (!%p1751_p3)
}
 0x550   :  { %1120 = dma.vmem_to_hbm [thread:$0]  %s1118_s16, 128, %s2081_s13, [#allocation21]  }
 0x551   :  { %1763 = dma.done.wait [#allocation6], 128  }
 0x552   :  { %1764 = vsyncadd [#allocation6], 4294967168 }
 0x553   :  { %1765 = dma.done.wait [#allocation18], 256  }
 0x554   :  { %1766 = vsyncadd [#allocation18], 4294967040 }
 0x555   :  { %1767 = dma.done.wait [#allocation21], 128  }
 0x556   :  { %1768 = vsyncadd [#allocation21], 4294967168 }
 0x557   :  { %1133 = vsyncpa [#allocation5], 1 }
 0x558   :  { %1134 = vsyncpa [#allocation8], 1 }
 0x559   :  { %1135 = vsyncpa [#allocation11], 1 }
 0x55a   :  { %1136 = vsyncpa [#allocation14], 1 }
 0x55b   :  { %1137 = vsyncpa [#allocation6], 1 }
 0x55c   :  { %1138 = vsyncpa [#allocation18], 1 }
 0x55d   :  { %1139 = vsyncpa [#allocation21], 1 }

</bundles_post_ra>
